<compile_context>
chip_gen: v5e
topology: v5e:2x2
jax: 0.10.0
libtpu: 0.0.40
codegen_flags: <defaults>
</compile_context>

<pallas_src>
import jax
import jax.numpy as jnp
from jax.experimental import pallas as pl
from jax.experimental.pallas import tpu as pltpu


_VMEM_BUDGET = 40 * 1024 * 1024   # working-set target (safe inside v7x's 64 MiB)
_VMEM_LIMIT = 48 * 1024 * 1024    # raise Mosaic's scoped-VMEM cap (16/32 MiB default)
_GRAM_NODE_CAP = 1024             # keep the resident Gram matrix a few MiB at most


def _round_up(x, m):
    return (x + m - 1) // m * m


def _split_f32_to_bf16x3(x):
    """Split f32 array into three bf16 components whose sum reconstructs x
    to <1 ulp.  (bf16x2 would be a VMEM/flop saving but is marginal against a
    2e-5 tolerance, so we keep bf16x3 and merge the three matmuls instead.)"""
    hi = x.astype(jnp.bfloat16)
    r1 = x - hi.astype(jnp.float32)
    mid = r1.astype(jnp.bfloat16)
    r2 = r1 - mid.astype(jnp.float32)
    lo = r2.astype(jnp.bfloat16)
    return hi, mid, lo


# ---------------------------------------------------------------------------
# Kernels
# ---------------------------------------------------------------------------

def _one_hot3_bf16(idx, n_pad, tb):
    """(3*n_pad, TB) bf16 one-hot with a 1 at rows idx, idx+n_pad, idx+2*n_pad
    of each column -- matches a table whose bf16x3 components are concatenated
    along the contraction axis, so a single K=3*n_pad matmul reconstructs the
    original f32 rows exactly (f32 accumulation)."""
    row = jax.lax.broadcasted_iota(jnp.int32, (3 * n_pad, tb), 0)
    hit = (row == idx) | (row == idx + n_pad) | (row == idx + 2 * n_pad)
    return hit.astype(jnp.bfloat16)


def _dne_gram_kernel(s_idx_ref, r_idx_ref, g_ref, o_ref):
    """Small-node path: select G[s_idx, r_idx] per batch lane.

    s_idx_ref, r_idx_ref : (1, TB)           int32, lane-dense.
    g_ref                : (Np_s, 3*Np_r)    bf16 merged bf16x3 of the
                                             pre-normalized Gram matrix
                                             (VMEM-resident across the grid).
    o_ref                : (1, TB)           f32 scores, lane-dense.
    """
    tb = o_ref.shape[1]
    np_s = g_ref.shape[0]
    np_r = g_ref.shape[1] // 3

    # tmp[:, b] = G[:, r_idx[b]]   (exact f32 reconstruction via one MXU matmul)
    oh_r3 = _one_hot3_bf16(r_idx_ref[...], np_r, tb)                      # (3Np_r, TB)
    tmp = jnp.dot(g_ref[...], oh_r3, preferred_element_type=jnp.float32)  # (Np_s, TB)

    # out[b] = tmp[s_idx[b], b]  via a {0,1} f32 mask + sublane reduce (exact).
    row = jax.lax.broadcasted_iota(jnp.int32, (np_s, tb), 0)
    oh_s = (row == s_idx_ref[...]).astype(jnp.float32)                    # (Np_s, TB)
    o_ref[...] = jnp.sum(oh_s * tmp, axis=0, keepdims=True)


def _dne_gather_kernel(s_idx_ref, r_idx_ref, s_tab_ref, r_tab_ref, o_ref):
    """General path: gather pre-normalized rows with a merged K=3*Npad one-hot
    MXU matmul, then a fused dot along D.

    s_tab_ref, r_tab_ref : (D, 3*Npad) bf16, rows already L2-normalized,
                           transposed, bf16x3-merged; VMEM-resident.
    """
    tb = o_ref.shape[1]
    n_pad = s_tab_ref.shape[1] // 3

    oh_s3 = _one_hot3_bf16(s_idx_ref[...], n_pad, tb)
    oh_r3 = _one_hot3_bf16(r_idx_ref[...], n_pad, tb)

    s_t = jnp.dot(s_tab_ref[...], oh_s3, preferred_element_type=jnp.float32)  # (D, TB)
    r_t = jnp.dot(r_tab_ref[...], oh_r3, preferred_element_type=jnp.float32)  # (D, TB)

    o_ref[...] = jnp.sum(s_t * r_t, axis=0, keepdims=True)                    # (1, TB)


# ---------------------------------------------------------------------------
# Wrapper: prep (once per weight update) + forward (per batch)
# ---------------------------------------------------------------------------

def prepare_dne(sender_table, receiver_table, *, gram_node_limit=None):
    """One-time table prep (hoisted out of the per-call path): normalize rows,
    pick the Gram vs. gather strategy, pad/transpose/bf16x3-split/merge."""
    sender_table = jnp.asarray(sender_table, jnp.float32)
    receiver_table = jnp.asarray(receiver_table, jnp.float32)
    node_num, dim = sender_table.shape
    assert receiver_table.shape == (node_num, dim)

    # Per-node L2 normalization (equivalent to normalizing the gathered rows).
    s_n = sender_table / jnp.linalg.norm(sender_table, axis=1, keepdims=True)
    r_n = receiver_table / jnp.linalg.norm(receiver_table, axis=1, keepdims=True)

    if gram_node_limit is None:
        # MAC crossover: Gram select ~3*N^2*TB vs gather ~6*D*N*TB  =>  N < 2*D.
        gram_node_limit = 2 * dim

    if 0 < node_num <= min(gram_node_limit, _GRAM_NODE_CAP):
        # G[i, j] = <s_n[i], r_n[j]>; the kernel only selects G[s_idx, r_idx].
        g = jnp.dot(s_n, r_n.T, precision=jax.lax.Precision.HIGHEST)
        np_s = _round_up(node_num, 16)     # bf16 sublane packing
        np_r = _round_up(node_num, 128)    # lane width
        g = jnp.pad(g, ((0, np_s - node_num), (0, np_r - node_num)))
        g_merged = jnp.concatenate(_split_f32_to_bf16x3(g), axis=1)   # (np_s, 3*np_r)
        return dict(mode="gram", node_num=node_num, dim=dim,
                    np_s=np_s, np_r=np_r, tables=(g_merged,))

    n_pad = _round_up(node_num, 128)

    def prep(tab):
        t = jnp.pad(tab.T, ((0, 0), (0, n_pad - node_num)))           # (D, n_pad)
        return jnp.concatenate(_split_f32_to_bf16x3(t), axis=1)       # (D, 3*n_pad)

    return dict(mode="gather", node_num=node_num, dim=dim,
                n_pad=n_pad, tables=(prep(s_n), prep(r_n)))


def _table_spec(shape, single_buffer):
    index_map = lambda i: (0,) * len(shape)   # constant block -> resident in VMEM
    if single_buffer:
        # Constant index_map: a single buffer suffices -> halves resident-table
        # VMEM vs. the default double-buffering.
        return pl.BlockSpec(shape, index_map, pipeline_mode=pl.Buffered(1))
    return pl.BlockSpec(shape, index_map)


def _launch(kernel, idx_args, tables, b_pad, tb, vmem_limit):
    num_tiles = b_pad // tb

    def call(single_buffer):
        batch_spec = pl.BlockSpec((1, tb), lambda i: (0, i))
        tab_specs = [_table_spec(t.shape, single_buffer) for t in tables]
        return pl.pallas_call(
            kernel,
            out_shape=jax.ShapeDtypeStruct((1, b_pad), jnp.float32),
            grid_spec=pltpu.PrefetchScalarGridSpec(
                num_scalar_prefetch=0,
                grid=(num_tiles,),
                in_specs=[batch_spec, batch_spec] + tab_specs,
                out_specs=pl.BlockSpec((1, tb), lambda i: (0, i)),   # lane-dense
            ),
            # "parallel": shard batch tiles over both TCs on v7x (no-op v5e/v6e).
            # Each TC keeps its own resident copy of the small tables.
            compiler_params=pltpu.CompilerParams(
                dimension_semantics=("parallel",),
                vmem_limit_bytes=vmem_limit),
        )(*idx_args, *tables)

    try:
        return call(single_buffer=True)
    except Exception:
        # pl.Buffered(1) unsupported in this build -> default buffering (the
        # VMEM budget below already assumes 2 buffers, so sizing stays valid).
        return call(single_buffer=False)


def _choose_tb(per_lane_bytes, const_bytes, batch, tb_max):
    """Largest multiple-of-128 batch tile whose working set fits the budget
    (budget chosen for v7x's 64 MiB per-TC VMEM; generous on v5e/v6e)."""
    tb_fit = (_VMEM_BUDGET - const_bytes) // int(per_lane_bytes * 1.5)  # 1.5x fudge
    tb = min(tb_max, int(tb_fit), _round_up(batch, 128))
    return max(128, (tb // 128) * 128)


def dne_forward_prepared(params, sender_idx, receiver_idx, *, tb_max=4096):
    """Per-batch forward using prepped tables (call prepare_dne once per
    weight update and reuse the result)."""
    assert tb_max % 128 == 0, "tb_max must be a multiple of 128 (lane width)"
    node_num = params["node_num"]
    b = sender_idx.shape[0]

    # Clamp (matches jnp.take's clamping) so an out-of-range index can never
    # produce an all-zero one-hot.
    s_idx = jnp.clip(jnp.asarray(sender_idx, jnp.int32), 0, node_num - 1)
    r_idx = jnp.clip(jnp.asarray(receiver_idx, jnp.int32), 0, node_num - 1)

    if params["mode"] == "gram":
        kernel = _dne_gram_kernel
        # per-lane VMEM: bf16 one-hot (3*np_r) + f32 one-hot + f32 tmp (np_s each)
        per_lane = 3 * params["np_r"] * 2 + params["np_s"] * 8 + 32
    else:
        kernel = _dne_gather_kernel
        # per-lane VMEM: two bf16 one-hots (3*n_pad each) + two (D,) f32 gathers
        per_lane = 2 * 3 * params["n_pad"] * 2 + 2 * params["dim"] * 4 + 32
    # Resident-table bytes, assuming worst case of 2 pipeline buffers.
    const = 2 * sum(t.size * t.dtype.itemsize for t in params["tables"])

    tb = _choose_tb(per_lane, const, b, tb_max)
    b_pad = _round_up(b, tb)
    pad = b_pad - b
    s_idx = jnp.pad(s_idx, (0, pad)).reshape(1, b_pad)
    r_idx = jnp.pad(r_idx, (0, pad)).reshape(1, b_pad)

    out = _launch(kernel, (s_idx, r_idx), params["tables"], b_pad, tb, _VMEM_LIMIT)
    return out[0, :b]


def dne_forward(sender_table, receiver_table, sender_idx, receiver_idx,
                *, tb_max=4096, gram_node_limit=None):
    """Convenience one-shot: prep + forward (prep should be cached/hoisted for
    repeated inference with the same weights)."""
    params = prepare_dne(sender_table, receiver_table,
                         gram_node_limit=gram_node_limit)
    return dne_forward_prepared(params, sender_idx, receiver_idx, tb_max=tb_max)


if __name__ == "__main__":
    node_num = 32
    dim = 128          # module default
    batch = 300        # exercises multi-tile grid + lane padding

    key = jax.random.PRNGKey(0)
    k_send, k_recv, k_si, k_ri = jax.random.split(key, 4)

    # nn.Embedding default init is N(0, 1) -- reproduce deterministically.
    sender_table = jax.random.normal(k_send, (node_num, dim), dtype=jnp.float32)
    receiver_table = jax.random.normal(k_recv, (node_num, dim), dtype=jnp.float32)
    sender_idx = jax.random.randint(k_si, (batch,), 0, node_num, dtype=jnp.int32)
    receiver_idx = jax.random.randint(k_ri, (batch,), 0, node_num, dtype=jnp.int32)

    # Pure-JAX reference (same math as the torch forward).
    s = jnp.take(sender_table, sender_idx, axis=0)
    r = jnp.take(receiver_table, receiver_idx, axis=0)
    s = s / jnp.linalg.norm(s, axis=1, keepdims=True)
    r = r / jnp.linalg.norm(r, axis=1, keepdims=True)
    ref = jnp.sum(s * r, axis=1)

    # Path 1: Gram-select kernel (default for node_num <= 2*dim).
    # tb_max=128 just to exercise a >1 grid at this tiny batch.
    out_gram = dne_forward(sender_table, receiver_table,
                           sender_idx, receiver_idx, tb_max=128)
    out_gram = jax.block_until_ready(out_gram)
    assert out_gram.shape == (batch,)
    assert jnp.allclose(out_gram, ref, atol=2e-5, rtol=2e-5), (
        float(jnp.max(jnp.abs(out_gram - ref))))

    # Path 2: force the merged one-hot gather kernel (used for larger node_num).
    prep = prepare_dne(sender_table, receiver_table, gram_node_limit=0)
    out_gather = dne_forward_prepared(prep, sender_idx, receiver_idx, tb_max=512)
    out_gather = jax.block_until_ready(out_gather)
    assert out_gather.shape == (batch,)
    assert jnp.allclose(out_gather, ref, atol=2e-5, rtol=2e-5), (
        float(jnp.max(jnp.abs(out_gather - ref))))

    print("KERNEL_OK")
</pallas_src>

<mosaic_0001>
module attributes {stable_mosaic.version = 11 : i64} {
  func.func @_dne_gram_kernel(%arg0: i32, %arg1: memref<1x128xi32, #tpu.memory_space<vmem>>, %arg2: memref<1x128xi32, #tpu.memory_space<vmem>>, %arg3: memref<32x384xbf16, #tpu.memory_space<vmem>>, %arg4: memref<1x128xf32, #tpu.memory_space<vmem>>) attributes {dimension_semantics = [#tpu.dimension_semantics<parallel>], iteration_bounds = array<i64: 3>, scalar_prefetch = 0 : i64, scratch_operands = 0 : i64, tpu.core_type = #tpu.core_type<tc>, window_params = [{transform_indices = @transform_0, window_bounds = array<i64: 1, 128>}, {transform_indices = @transform_1, window_bounds = array<i64: 1, 128>}, {pipeline_mode = #tpu.pipeline_mode<synchronous>, transform_indices = @transform_2, window_bounds = array<i64: 32, 384>}, {transform_indices = @transform_3, window_bounds = array<i64: 1, 128>}]} {
    %c0 = arith.constant 0 : index
    %c0_0 = arith.constant 0 : index
    %0 = vector.load %arg2[%c0, %c0_0] : memref<1x128xi32, #tpu.memory_space<vmem>>, vector<1x128xi32>
    %1 = tpu.iota {dimensions = array<i32: 0>} : vector<384x128xi32>
    %2 = vector.broadcast %0 : vector<1x128xi32> to vector<384x128xi32>
    %3 = arith.cmpi eq, %1, %2 : vector<384x128xi32>
    %c128_i32 = arith.constant 128 : i32
    %4 = vector.broadcast %c128_i32 : i32 to vector<1x128xi32>
    %5 = arith.addi %0, %4 : vector<1x128xi32>
    %6 = vector.broadcast %5 : vector<1x128xi32> to vector<384x128xi32>
    %7 = arith.cmpi eq, %1, %6 : vector<384x128xi32>
    %8 = arith.ori %3, %7 : vector<384x128xi1>
    %c256_i32 = arith.constant 256 : i32
    %9 = vector.broadcast %c256_i32 : i32 to vector<1x128xi32>
    %10 = arith.addi %0, %9 : vector<1x128xi32>
    %11 = vector.broadcast %10 : vector<1x128xi32> to vector<384x128xi32>
    %12 = arith.cmpi eq, %1, %11 : vector<384x128xi32>
    %13 = arith.ori %8, %12 : vector<384x128xi1>
    %14 = arith.extui %13 : vector<384x128xi1> to vector<384x128xi32>
    %15 = arith.sitofp %14 : vector<384x128xi32> to vector<384x128xf32>
    %16 = arith.truncf %15 : vector<384x128xf32> to vector<384x128xbf16>
    %c0_1 = arith.constant 0 : index
    %c0_2 = arith.constant 0 : index
    %17 = vector.load %arg3[%c0_1, %c0_2] : memref<32x384xbf16, #tpu.memory_space<vmem>>, vector<32x384xbf16>
    %cst = arith.constant dense<0.000000e+00> : vector<32x128xf32>
    %18 = tpu.matmul %17, %16, %cst {dimension_numbers = #tpu.dot_dimension_numbers<[1], [0], [0], [1], [0, 0, 1, 1], [], []>} : vector<32x384xbf16>, vector<384x128xbf16>, vector<32x128xf32> -> vector<32x128xf32>
    %19 = tpu.iota {dimensions = array<i32: 0>} : vector<32x128xi32>
    %c0_3 = arith.constant 0 : index
    %c0_4 = arith.constant 0 : index
    %20 = vector.load %arg1[%c0_3, %c0_4] : memref<1x128xi32, #tpu.memory_space<vmem>>, vector<1x128xi32>
    %21 = vector.broadcast %20 : vector<1x128xi32> to vector<32x128xi32>
    %22 = arith.cmpi eq, %19, %21 : vector<32x128xi32>
    %23 = arith.extui %22 : vector<32x128xi1> to vector<32x128xi32>
    %24 = arith.sitofp %23 : vector<32x128xi32> to vector<32x128xf32>
    %25 = arith.mulf %24, %18 : vector<32x128xf32>
    %cst_5 = arith.constant dense<0.000000e+00> : vector<128xf32>
    %26 = vector.multi_reduction <add>, %25, %cst_5 [0] : vector<32x128xf32> to vector<128xf32>
    %27 = vector.shape_cast %26 : vector<128xf32> to vector<1x128xf32>
    %c0_6 = arith.constant 0 : index
    %c0_7 = arith.constant 0 : index
    %28 = vector.load %arg4[%c0_6, %c0_7] : memref<1x128xf32, #tpu.memory_space<vmem>>, vector<1x128xf32>
    tpu.vector_store %arg4[%c0_6, %c0_7], %27 {strides = array<i32>} : memref<1x128xf32, #tpu.memory_space<vmem>>, vector<1x128xf32>,
    return
  }
  func.func @transform_0(%arg0: i32) -> (i32, i32) {
    %c0_i32 = arith.constant 0 : i32
    %c0_i32_0 = arith.constant 0 : i32
    return %c0_i32, %arg0 : i32, i32
  }
  func.func @transform_1(%arg0: i32) -> (i32, i32) {
    %c0_i32 = arith.constant 0 : i32
    %c0_i32_0 = arith.constant 0 : i32
    return %c0_i32, %arg0 : i32, i32
  }
  func.func @transform_2(%arg0: i32) -> (i32, i32) {
    %c0_i32 = arith.constant 0 : i32
    %c0_i32_0 = arith.constant 0 : i32
    %c0_i32_1 = arith.constant 0 : i32
    return %c0_i32, %c0_i32_0 : i32, i32
  }
  func.func @transform_3(%arg0: i32) -> (i32, i32) {
    %c0_i32 = arith.constant 0 : i32
    %c0_i32_0 = arith.constant 0 : i32
    return %c0_i32, %arg0 : i32, i32
  }
}

module attributes {stable_mosaic.version = 11 : i64} {
  func.func @_dne_gram_kernel(%arg0: i32, %arg1: memref<1x128xi32, #tpu.memory_space<vmem>>, %arg2: memref<1x128xi32, #tpu.memory_space<vmem>>, %arg3: memref<32x384xbf16, #tpu.memory_space<vmem>>, %arg4: memref<1x128xf32, #tpu.memory_space<vmem>>) attributes {dimension_semantics = [#tpu.dimension_semantics<parallel>], iteration_bounds = array<i64: 3>, scalar_prefetch = 0 : i64, scratch_operands = 0 : i64, tpu.core_type = #tpu.core_type<tc>, window_params = [{transform_indices = @transform_0, window_bounds = array<i64: 1, 128>}, {transform_indices = @transform_1, window_bounds = array<i64: 1, 128>}, {pipeline_mode = #tpu.pipeline_mode<synchronous>, transform_indices = @transform_2, window_bounds = array<i64: 32, 384>}, {transform_indices = @transform_3, window_bounds = array<i64: 1, 128>}]} {
    %c0 = arith.constant 0 : index
    %c0_0 = arith.constant 0 : index
    %0 = vector.load %arg2[%c0, %c0_0] : memref<1x128xi32, #tpu.memory_space<vmem>>, vector<1x128xi32>
    %1 = tpu.iota {dimensions = array<i32: 0>} : vector<384x128xi32>
    %2 = vector.broadcast %0 : vector<1x128xi32> to vector<384x128xi32>
    %3 = arith.cmpi eq, %1, %2 : vector<384x128xi32>
    %c128_i32 = arith.constant 128 : i32
    %4 = vector.broadcast %c128_i32 : i32 to vector<1x128xi32>
    %5 = arith.addi %0, %4 : vector<1x128xi32>
    %6 = vector.broadcast %5 : vector<1x128xi32> to vector<384x128xi32>
    %7 = arith.cmpi eq, %1, %6 : vector<384x128xi32>
    %8 = arith.ori %3, %7 : vector<384x128xi1>
    %c256_i32 = arith.constant 256 : i32
    %9 = vector.broadcast %c256_i32 : i32 to vector<1x128xi32>
    %10 = arith.addi %0, %9 : vector<1x128xi32>
    %11 = vector.broadcast %10 : vector<1x128xi32> to vector<384x128xi32>
    %12 = arith.cmpi eq, %1, %11 : vector<384x128xi32>
    %13 = arith.ori %8, %12 : vector<384x128xi1>
    %14 = arith.extui %13 : vector<384x128xi1> to vector<384x128xi32>
    %15 = arith.sitofp %14 : vector<384x128xi32> to vector<384x128xf32>
    %16 = arith.truncf %15 : vector<384x128xf32> to vector<384x128xbf16>
    %c0_1 = arith.constant 0 : index
    %c0_2 = arith.constant 0 : index
    %17 = vector.load %arg3[%c0_1, %c0_2] : memref<32x384xbf16, #tpu.memory_space<vmem>>, vector<32x384xbf16>
    %cst = arith.constant dense<0.000000e+00> : vector<32x128xf32>
    %18 = tpu.matmul %17, %16, %cst {dimension_numbers = #tpu.dot_dimension_numbers<[1], [0], [0], [1], [0, 0, 1, 1], [], []>} : vector<32x384xbf16>, vector<384x128xbf16>, vector<32x128xf32> -> vector<32x128xf32>
    %19 = tpu.iota {dimensions = array<i32: 0>} : vector<32x128xi32>
    %c0_3 = arith.constant 0 : index
    %c0_4 = arith.constant 0 : index
    %20 = vector.load %arg1[%c0_3, %c0_4] : memref<1x128xi32, #tpu.memory_space<vmem>>, vector<1x128xi32>
    %21 = vector.broadcast %20 : vector<1x128xi32> to vector<32x128xi32>
    %22 = arith.cmpi eq, %19, %21 : vector<32x128xi32>
    %23 = arith.extui %22 : vector<32x128xi1> to vector<32x128xi32>
    %24 = arith.sitofp %23 : vector<32x128xi32> to vector<32x128xf32>
    %25 = arith.mulf %24, %18 : vector<32x128xf32>
    %cst_5 = arith.constant dense<0.000000e+00> : vector<128xf32>
    %26 = vector.multi_reduction <add>, %25, %cst_5 [0] : vector<32x128xf32> to vector<128xf32>
    %27 = vector.shape_cast %26 : vector<128xf32> to vector<1x128xf32>
    %c0_6 = arith.constant 0 : index
    %c0_7 = arith.constant 0 : index
    %28 = vector.load %arg4[%c0_6, %c0_7] : memref<1x128xf32, #tpu.memory_space<vmem>>, vector<1x128xf32>
    tpu.vector_store %arg4[%c0_6, %c0_7], %27 {strides = array<i32>} : memref<1x128xf32, #tpu.memory_space<vmem>>, vector<1x128xf32>,
    return
  }
  func.func @transform_0(%arg0: i32) -> (i32, i32) {
    %c0_i32 = arith.constant 0 : i32
    %c0_i32_0 = arith.constant 0 : i32
    return %c0_i32, %arg0 : i32, i32
  }
  func.func @transform_1(%arg0: i32) -> (i32, i32) {
    %c0_i32 = arith.constant 0 : i32
    %c0_i32_0 = arith.constant 0 : i32
    return %c0_i32, %arg0 : i32, i32
  }
  func.func @transform_2(%arg0: i32) -> (i32, i32) {
    %c0_i32 = arith.constant 0 : i32
    %c0_i32_0 = arith.constant 0 : i32
    %c0_i32_1 = arith.constant 0 : i32
    return %c0_i32, %c0_i32_0 : i32, i32
  }
  func.func @transform_3(%arg0: i32) -> (i32, i32) {
    %c0_i32 = arith.constant 0 : i32
    %c0_i32_0 = arith.constant 0 : i32
    return %c0_i32, %arg0 : i32, i32
  }
}

</mosaic_0001>

<bundles_post_ra>
// kernel: tpu_custom_call.1
= control target key start
LH: loop header
LB: loop body
LE: loop exit
PB: predicated region body
PF: predicated region fallthrough
CT: control target
= control target key end

     0   :  { %s1709_s0 = inlined_call_operand.hbm [shape: s32[1,384], index: 0, kind: input, shape index: {}]   ;;  %s1710_s1 = inlined_call_operand.hbm [shape: s32[1,384], index: 1, kind: input, shape index: {}]   ;;  %s1711_s2 = inlined_call_operand.hbm [shape: bf16[32,384], index: 2, kind: input, shape index: {}]   ;;  %s1712_s3 = inlined_call_operand.hbm [shape: f32[1,384], index: 3, kind: output, shape index: {}]  }
   0x1   :  { %1713 = sst [smem:[#allocation14_spill]] %s1711_s2 }
   0x2   :  { %8 = vsyncpa [#allocation3], 0 }
   0x3   :  { %10 = vsyncpa [#allocation3 + $0x1], 0 }
   0x4   :  { %11 = vsyncpa [#allocation6], 0 }
   0x5   :  { %13 = vsyncpa [#allocation6 + $0x1], 0 }
   0x6   :  { %14 = vsyncpa [#allocation4], 0 }
   0x7   :  { %16 = vsyncpa [#allocation4 + $0x1], 0  ;;  %s1282_s12 = smov 0   ;;  %s1284_s13 = smov 0  }
   0x8   :  { %s1286_s14 = smov 0   ;;  %s1288_s15 = smov 0  }
   0x9 LB: > { %s1714_s2 = sld [smem:[#allocation14_spill]]  ;;  %s1306_s19 = sadd.s32 4294967295, %s1255_s15   ;;  %s1255_s15 = sphi %s1288_s15, %s1728_s15   ;;  %s1251_s14 = sphi %s1286_s14, %s1727_s14   ;;  %s1247_s13 = sphi %s1284_s13, %s1726_s13   ;;  %s1243_s12 = sphi %s1282_s12, %s1725_s12  }
   0xa   : > { %p878_p0 = scmp.ge.s32.totalorder %s1255_s15, 1  ;;  %p43_p1 = scmp.eq.s32.totalorder %s1306_s19, 0 }
   0xb   : > { %p126_p2 = scmp.lt.s32.totalorder %s1255_s15, 4  ;;  %s1257_s21 = smov [#allocation7]  }
   0xc   : > { %s139_s22 = sshll.u32 %s1257_s21, 4  ;;  %s1258_s23 = smov 192   ;;  %s140_s22 = int_to_ptr.vmem [resolvable:$true] %s139_s22 }
   0xd   : > { %p1311_p3 = pnand %p878_p0, %p126_p2  ;;  %s1259_s24 = smov 12  }
   0xe   : > { %s877_s25 = sadd.s32 4294967294, %s1255_s15   ;;  %s1321_s26 = sadd.s32 1, %s1255_s15  }
   0xf   : > { %s137_s18 = sshll.u32 %s1714_s2, 4  ;;  %p1033_p4 = pneg %p1311_p3  ;;  %s138_s18 = int_to_ptr.hbm [resolvable:$true] %s137_s18 }
  0x10   : > { %s29_s27 = sadd.s32 1, %s1251_s14  ;;  %s26_s28 = ssub.s32 %s1255_s15, %s1321_s26 }
  0x11   : > { %p1034_p5 = pnand %p1033_p4, %p43_p1  ;;  %p36_p6 = scmp.ne.s32.totalorder %s1251_s14, %s1247_s13 }
  0x12   : > { %p27_p7 = scmp.eq.s32.totalorder %s26_s28, 0  ;;  %p37_p8 = scmp.eq.s32.totalorder %s1255_s15, 0 }
  0x13   : > { %1036 = dma.hbm_to_vmem [thread:$0]  (!%p1034_p5), %s138_s18, 768, %s140_s22, [#allocation6], %s1258_s23, %s1258_s23, %s1259_s24  }
  0x14   : > { %p42_p9 = scmp.ne.s32.totalorder %s1247_s13, %s1243_s12  ;;  %p113_p10 = scmp.eq.s32.totalorder %s1306_s19, 2 }
  0x15   : > { %s1333_s29 = scalar_select %p27_p7, %s1251_s14, %s29_s27  }
  0x16   : > { %p1335_p11 = por %p37_p8, %p36_p6  ;;  %p1341_p12 = por %p43_p1, %p42_p9 }
  0x17   : > { %1716 = sst [smem:[#allocation13_spill]] %s1333_s29  ;;  %p1345_p13 = por %p113_p10, %p36_p6 }
  0x18   : > { %p119_p0 = scmp.eq.s32.totalorder %s877_s25, 2  ;;  %p1049_p2 = scmp.lt.s32.totalorder %s1255_s15, 3 }
  0x19   : > { %s153_s6 = sand.u32 1, %s1251_s14   ;;  %s159_s10 = scalar_lea.hbm %s1709_s0, %s1255_s15 }
  0x1a   : > { %p1351_p4 = por %p119_p0, %p42_p9  ;;  %s161_s11 = sshll.u32 %s159_s10, 4  ;;  %s162_s11 = int_to_ptr.hbm [resolvable:$true] %s161_s11 }
  0x1b   : > { %s156_s16 = scalar_lea.vmem [#allocation2], %s153_s6  ;;  %p1361_p5 = pnand %p1049_p2, %p1335_p11 }
  0x1c   : > { %s163_s17 = sshll.u32 %s156_s16, 4  ;;  %s170_s21 = sand.u32 1, %s1255_s15   ;;  %s164_s17 = int_to_ptr.vmem [resolvable:$true] %s163_s17 }
  0x1d   : > { %s176_s24 = scalar_lea.hbm %s1710_s1, %s1255_s15  ;;  %s154_s25 = scalar_lea.sflag [#allocation3], %s153_s6 }
  0x1e   : > { %s1121_s27 = sshra.s32 %s162_s11, 4  ;;  %p1125_p7 = pneg %p1361_p5  ;;  %s1122_s27 = int_to_ptr.hbm [resolvable:$true] %s1121_s27 }
  0x1f   : > { %s1123_s28 = scalar_lea.hbm %s1122_s27, 1  ;;  %s1128_s9 = scalar_lea.hbm %s1709_s0, 3 }
  0x20   : > { %p1124_p6 = scmp.ne.s32.totalorder %s1122_s27, %s1123_s28  ;;  %p1129_p10 = scmp.lt.s32.totalorder %s1122_s27, %s1709_s0 }
  0x21   : > { %p1130_p11 = scmp.lt.s32.totalorder %s1128_s9, %s1123_s28 }
  0x22   : > { %p1126_p8 = pnand %p1125_p7, %p1124_p6 }
  0x23   : > { %p1131_p0 = por %p1130_p11, %p1129_p10 }
  0x24   : > { %p1127_p9 = pneg %p1126_p8 }
  0x26   : > { %p1132_p2 = pnand %p1131_p0, %p1127_p9 }
  0x28   : > { %1135 = shalt.err (!%p1132_p2)
}
  0x29   : > { %1040 = dma.hbm_to_vmem [thread:$0]  (!%p1361_p5), %s162_s11, 16, %s164_s17, %s154_s25  }
  0x2a   : > { %s178_s22 = sshll.u32 %s176_s24, 4  ;;  %s173_s23 = scalar_lea.vmem [#allocation5], %s153_s6  ;;  %s179_s22 = int_to_ptr.hbm [resolvable:$true] %s178_s22 }
  0x2b   : > { %s180_s2 = sshll.u32 %s173_s23, 4  ;;  %s171_s29 = scalar_lea.sflag [#allocation6], %s170_s21  ;;  %s181_s2 = int_to_ptr.vmem [resolvable:$true] %s180_s2 }
  0x2c   : > { %s1151_s30 = sshra.s32 %s179_s22, 4  ;;  %s1158_s9 = scalar_lea.hbm %s1710_s1, 3  ;;  %s1152_s30 = int_to_ptr.hbm [resolvable:$true] %s1151_s30 }
  0x2d   : > { %s1153_s8 = scalar_lea.hbm %s1152_s30, 1  ;;  %p1159_p9 = scmp.lt.s32.totalorder %s1152_s30, %s1710_s1 }
  0x2e   : > { %p1154_p6 = scmp.ne.s32.totalorder %s1152_s30, %s1153_s8  ;;  %p1160_p11 = scmp.lt.s32.totalorder %s1158_s9, %s1153_s8 }
  0x30   : > { %p1156_p8 = pnand %p1154_p6, %p1125_p7  ;;  %p1161_p0 = por %p1160_p11, %p1159_p9 }
  0x32   : > { %p1157_p10 = pneg %p1156_p8 }
  0x34   : > { %p1162_p2 = pnand %p1161_p0, %p1157_p10 }
  0x36   : > { %1165 = shalt.err (!%p1162_p2)
}
  0x37   : > { %1043 = dma.hbm_to_vmem [thread:$0]  (!%p1361_p5), %s179_s22, 16, %s181_s2, %s171_s29  }
  0x38   : > { %189 = sbr.rel (%p1311_p3) target bundleno = 374 (0x176), region = 32  ;;  %s1397_s6 = sand.u32 (!%p1311_p3), 1, %s1247_s13  }
  0x39   : > { %s192_s17 = scalar_lea.sflag (!%p1311_p3), [#allocation3], %s1397_s6  ;;  %s194_s21 = scalar_lea.vmem (!%p1311_p3), [#allocation2], %s1397_s6 }
  0x3d   : > { %1226 = dma.done.wait (%p1341_p12), %s192_s17, 16  }
  0x3e   : > { %1228 = vsyncadd (%p1341_p12), %s192_s17, 4294967280  ;;  %s200_s2 = sand.u32 1, %s1306_s19   ;;  %s203_s20 = scalar_lea.vmem [#allocation5], %s1397_s6 }
  0x3f   : > { %s201_s29 = scalar_lea.sflag [#allocation6], %s200_s2 }
  0x40   : > { %1230 = dma.done.wait (%p1341_p12), %s201_s29, 16  }
  0x41   : > { %1232 = vsyncadd (%p1341_p12), %s201_s29, 4294967280 }
  0x42   : > { %1234 = dma.done.wait (%p43_p1), [#allocation6], 768  }
  0x43   : > { %1236 = vsyncadd (%p43_p1), [#allocation6], 4294966528  ;;  %v235_v0 = vlaneseq  ;;  %v234_v4 = vld [vmem:[%s203_s20] sm:$0x1]  ;;  %v1260_v14 = vmov 1.0|1.0   ;;  %s783_s24 = scalar_lea.hbm %s1712_s3, %s1306_s19 }
  0x44   : > { %v1419_v5 = vld [vmem:[%s203_s20] ss:$0 sm:$0xff]  ;;  %v333_v6 = vadd.s32 128, %v234_v4  ;;  %v431_v7 = vadd.s32 256, %v234_v4  ;;  %v933_v54 = vld [vmem:[#allocation7] sm:$0xf] }
  0x45   : > { %v1415_v1 = vshrl.u32 %v235_v0, 7  ;;  %v1010_v55 = vld [vmem:[#allocation7 + $0x8] sm:$0xf0]  ;;  %v945_v56 = vld [vmem:[#allocation7 + $0x18] sm:$0xf]  ;;  %s233_s25 = scalar_lea.vmem [#allocation8], %s1397_s6 }
  0x46   : > { %v1421_v8 = vperm.slane %v333_v6, 0  ;;  %v1423_v9 = vperm.slane %v431_v7, 0  ;;  %v1013_v57 = vld [vmem:[#allocation7 + $0x20] sm:$0xf0]  ;;  %v934_v61 = vor.u32 %v1010_v55, %v933_v54  ;;  %v935_v0 = vld [vmem:[#allocation7 + $0xc] sm:$0xf0] }
  0x47   : > { %v250_v2 = vadd.s32 112, %v1415_v1  ;;  %v251_v3 = vadd.s32 120, %v1415_v1  ;;  %v266_v10 = vadd.s32 240, %v1415_v1  ;;  %v267_v11 = vadd.s32 248, %v1415_v1  ;;  %v1009_v63 = vld [vmem:[#allocation7 + $0x4] sm:$0xf] }
  0x48   : > { %v282_v12 = vadd.s32 368, %v1415_v1  ;;  %v283_v13 = vadd.s32 376, %v1415_v1  ;;  %v248_v15 = vadd.s32 96, %v1415_v1  ;;  %v249_v16 = vadd.s32 104, %v1415_v1  ;;  %v1011_v4 = vld [vmem:[#allocation7 + $0x10] sm:$0xf0] }
  0x49   : > { %vm299_vm0 = vcmp.eq.s32.totalorder %v250_v2, %v1419_v5  ;;  %vm300_vm1 = vcmp.eq.s32.totalorder %v251_v3, %v1419_v5  ;;  %vm349_vm2 = vcmp.eq.s32.totalorder %v250_v2, %v1421_v8  ;;  %vm350_vm3 = vcmp.eq.s32.totalorder %v251_v3, %v1421_v8  ;;  %v1012_v6 = vld [vmem:[#allocation7 + $0x1c] sm:$0xf]  ;;  %v947_v7 = vld [vmem:[#allocation7 + $0x24] sm:$0xf0]  ;;  %s785_s16 = sshll.u32 %s233_s25, 4  ;;  %s787_s22 = sshll.u32 %s783_s24, 4  ;;  %s786_s16 = int_to_ptr.vmem [resolvable:$true] %s785_s16  ;;  %s788_s22 = int_to_ptr.hbm [resolvable:$true] %s787_s22 }
  0x4a   : > { %vm447_vm4 = vcmp.eq.s32.totalorder %v250_v2, %v1423_v9  ;;  %vm397_vm5 = vmor %vm299_vm0, %vm349_vm2  ;;  %vm448_vm6 = vcmp.eq.s32.totalorder %v251_v3, %v1423_v9  ;;  %vm315_vm9 = vcmp.eq.s32.totalorder %v266_v10, %v1419_v5  ;;  %vm365_vm10 = vcmp.eq.s32.totalorder %v266_v10, %v1421_v8  ;;  %v941_v3 = vld [vmem:[#allocation7 + $0x8] sm:$0xf]  ;;  %s775_s23 = scalar_lea.sflag [#allocation4], %s1397_s6  ;;  %s1195_s30 = sshra.s32 %s788_s22, 4  ;;  %s1196_s30 = int_to_ptr.hbm [resolvable:$true] %s1195_s30 }
  0x4b   : > { %vm398_vm7 = vmor %vm300_vm1, %vm350_vm3  ;;  %vm316_vm12 = vcmp.eq.s32.totalorder %v267_v11, %v1419_v5  ;;  %vm366_vm13 = vcmp.eq.s32.totalorder %v267_v11, %v1421_v8  ;;  %vm463_vm15 = vcmp.eq.s32.totalorder %v266_v10, %v1423_v9  ;;  %vm464_vm1 = vcmp.eq.s32.totalorder %v267_v11, %v1423_v9  ;;  %v953_v10 = vld [vmem:[#allocation7 + $0x20] sm:$0xf]  ;;  %v1014_v11 = vld [vmem:[#allocation7 + $0x28] sm:$0xf0]  ;;  %s1197_s8 = scalar_lea.hbm %s1196_s30, 1  ;;  %s1201_s19 = scalar_lea.hbm %s1712_s3, 3 }
  0x4c   : > { %vm495_vm8 = vmor %vm397_vm5, %vm447_vm4  ;;  %vm331_vm4 = vcmp.eq.s32.totalorder %v282_v12, %v1419_v5  ;;  %vm381_vm5 = vcmp.eq.s32.totalorder %v282_v12, %v1421_v8  ;;  %v264_v17 = vadd.s32 224, %v1415_v1  ;;  %v265_v18 = vadd.s32 232, %v1415_v1  ;;  %p1198_p1 = scmp.ne.s32.totalorder %s1196_s30, %s1197_s8  ;;  %p1202_p5 = scmp.lt.s32.totalorder %s1196_s30, %s1712_s3 }
  0x4d   : > { %vm496_vm11 = vmor %vm398_vm7, %vm448_vm6  ;;  %vm332_vm7 = vcmp.eq.s32.totalorder %v283_v13, %v1419_v5  ;;  %v280_v19 = vadd.s32 352, %v1415_v1  ;;  %v281_v20 = vadd.s32 360, %v1415_v1  ;;  %v246_v21 = vadd.s32 80, %v1415_v1  ;;  %p1203_p7 = scmp.lt.s32.totalorder %s1201_s19, %s1197_s8 }
  0x4e   : > { %vm955_vm14 = vmpackc.low %vm496_vm11, %vm495_vm8  ;;  %vm382_vm8 = vcmp.eq.s32.totalorder %v283_v13, %v1421_v8  ;;  %v247_v22 = vadd.s32 88, %v1415_v1  ;;  %v262_v23 = vadd.s32 208, %v1415_v1  ;;  %v263_v24 = vadd.s32 216, %v1415_v1  ;;  %p1199_p3 = pnand %p1198_p1, %p1345_p13 }
  0x4f   : > { %956 = vmatpush.bf16.msk.msra.mxu0 %vm955_vm14, %v1260_v14  ;;  %vm413_vm0 = vmor %vm315_vm9, %vm365_vm10  ;;  %1015 = vmatpush.bf16.msk.msra.mxu3 %vm955_vm14, %v1260_v14  ;;  %vm479_vm9 = vcmp.eq.s32.totalorder %v282_v12, %v1423_v9  ;;  %v278_v25 = vadd.s32 336, %v1415_v1  ;;  %v279_v26 = vadd.s32 344, %v1415_v1  ;;  %v244_v27 = vadd.s32 64, %v1415_v1  ;;  %p1204_p6 = por %p1203_p7, %p1202_p5 }
  0x50   : > { %vm414_vm2 = vmor %vm316_vm12, %vm366_vm13  ;;  %vm480_vm12 = vcmp.eq.s32.totalorder %v283_v13, %v1423_v9  ;;  %v245_v28 = vadd.s32 72, %v1415_v1  ;;  %v260_v29 = vadd.s32 192, %v1415_v1  ;;  %v261_v30 = vadd.s32 200, %v1415_v1  ;;  %p1200_p12 = pneg %p1199_p3 }
  0x51   : > { %vm511_vm3 = vmor %vm413_vm0, %vm463_vm15  ;;  %vm297_vm15 = vcmp.eq.s32.totalorder %v248_v15, %v1419_v5  ;;  %vm347_vm0 = vcmp.eq.s32.totalorder %v248_v15, %v1421_v8  ;;  %v276_v31 = vadd.s32 320, %v1415_v1  ;;  %v277_v32 = vadd.s32 328, %v1415_v1 }
  0x52   : > { %vm512_vm6 = vmor %vm414_vm2, %vm464_vm1  ;;  %vm298_vm2 = vcmp.eq.s32.totalorder %v249_v16, %v1419_v5  ;;  %v242_v33 = vadd.s32 48, %v1415_v1  ;;  %v243_v34 = vadd.s32 56, %v1415_v1  ;;  %v258_v35 = vadd.s32 176, %v1415_v1  ;;  %p1205_p8 = pnand %p1204_p6, %p1200_p12 }
  0x53   : > { %vm971_vm11 = vmpackc.low %vm512_vm6, %vm511_vm3  ;;  %vm348_vm3 = vcmp.eq.s32.totalorder %v249_v16, %v1421_v8  ;;  %v259_v36 = vadd.s32 184, %v1415_v1  ;;  %v274_v37 = vadd.s32 304, %v1415_v1  ;;  %v275_v38 = vadd.s32 312, %v1415_v1 }
  0x54   : > { %972 = vmatpush.bf16.msk.msra.mxu1 %vm971_vm11, %v1260_v14  ;;  %vm429_vm10 = vmor %vm331_vm4, %vm381_vm5  ;;  %vm445_vm11 = vcmp.eq.s32.totalorder %v248_v15, %v1423_v9  ;;  %vm446_vm5 = vcmp.eq.s32.totalorder %v249_v16, %v1423_v9  ;;  %v240_v39 = vadd.s32 32, %v1415_v1  ;;  %v241_v40 = vadd.s32 40, %v1415_v1 }
  0x55   : > { %vm430_vm13 = vmor %vm332_vm7, %vm382_vm8  ;;  %v256_v41 = vadd.s32 160, %v1415_v1  ;;  %v257_v42 = vadd.s32 168, %v1415_v1  ;;  %v272_v43 = vadd.s32 288, %v1415_v1  ;;  %v273_v44 = vadd.s32 296, %v1415_v1 }
  0x56   : > { %vm527_vm14 = vmor %vm429_vm10, %vm479_vm9  ;;  %vm313_vm9 = vcmp.eq.s32.totalorder %v264_v17, %v1419_v5  ;;  %vm363_vm10 = vcmp.eq.s32.totalorder %v264_v17, %v1421_v8  ;;  %v1588_v45 = vadd.s32 16, %v1415_v1  ;;  %v1592_v46 = vadd.s32 24, %v1415_v1 }
  0x57   : > { %vm528_vm1 = vmor %vm430_vm13, %vm480_vm12  ;;  %vm314_vm13 = vcmp.eq.s32.totalorder %v265_v18, %v1419_v5  ;;  %v254_v47 = vadd.s32 144, %v1415_v1  ;;  %v255_v48 = vadd.s32 152, %v1415_v1  ;;  %v270_v49 = vadd.s32 272, %v1415_v1 }
  0x58   : > { %vm987_vm6 = vmpackc.low %vm528_vm1, %vm527_vm14  ;;  %vm364_vm14 = vcmp.eq.s32.totalorder %v265_v18, %v1421_v8  ;;  %v271_v50 = vadd.s32 280, %v1415_v1  ;;  %v1627_v51 = vadd.s32 8, %v1415_v1  ;;  %v252_v52 = vadd.s32 128, %v1415_v1 }
  0x59   : > { %988 = vmatpush.bf16.msk.msra.mxu2 %vm987_vm6, %v1260_v14  ;;  %vm395_vm4 = vmor %vm297_vm15, %vm347_vm0  ;;  %vm461_vm6 = vcmp.eq.s32.totalorder %v264_v17, %v1423_v9  ;;  %vm462_vm0 = vcmp.eq.s32.totalorder %v265_v18, %v1423_v9  ;;  %v253_v53 = vadd.s32 136, %v1415_v1  ;;  %v268_v59 = vadd.s32 256, %v1415_v1 }
  0x5a   : > { %vm396_vm7 = vmor %vm298_vm2, %vm348_vm3  ;;  %v269_v60 = vadd.s32 264, %v1415_v1  ;;  %v946_v62 = vor.u32 %v1013_v57, %v945_v56  ;;  %v938_v2 = vor.u32 %v1009_v63, %v935_v0  ;;  %v954_v12 = vor.u32 %v1014_v11, %v953_v10 }
  0x5b   : > { %vm493_vm8 = vmor %vm395_vm4, %vm445_vm11  ;;  %vm329_vm11 = vcmp.eq.s32.totalorder %v280_v19, %v1419_v5  ;;  %vm379_vm4 = vcmp.eq.s32.totalorder %v280_v19, %v1421_v8 }
  0x5c   : > { %vm494_vm12 = vmor %vm396_vm7, %vm446_vm5  ;;  %vm330_vm7 = vcmp.eq.s32.totalorder %v281_v20, %v1419_v5 }
  0x5d   : > { %vm957_vm1 = vmpackc.low %vm494_vm12, %vm493_vm8  ;;  %vm380_vm8 = vcmp.eq.s32.totalorder %v281_v20, %v1421_v8 }
  0x5e   : > { %958 = vmatpush.bf16.msk.msra.mxu0 %vm957_vm1, %v1260_v14  ;;  %vm411_vm15 = vmor %vm313_vm9, %vm363_vm10  ;;  %1016 = vmatpush.bf16.msk.msra.mxu3 %vm957_vm1, %v1260_v14  ;;  %vm477_vm9 = vcmp.eq.s32.totalorder %v280_v19, %v1423_v9 }
  0x5f   : > { %vm412_vm2 = vmor %vm314_vm13, %vm364_vm14  ;;  %vm478_vm13 = vcmp.eq.s32.totalorder %v281_v20, %v1423_v9 }
  0x60   : > { %vm509_vm3 = vmor %vm411_vm15, %vm461_vm6  ;;  %vm295_vm6 = vcmp.eq.s32.totalorder %v246_v21, %v1419_v5  ;;  %vm345_vm15 = vcmp.eq.s32.totalorder %v246_v21, %v1421_v8 }
  0x61   : > { %vm510_vm5 = vmor %vm412_vm2, %vm462_vm0  ;;  %vm296_vm2 = vcmp.eq.s32.totalorder %v247_v22, %v1419_v5 }
  0x62   : > { %vm973_vm12 = vmpackc.low %vm510_vm5, %vm509_vm3  ;;  %vm346_vm3 = vcmp.eq.s32.totalorder %v247_v22, %v1421_v8 }
  0x63   : > { %974 = vmatpush.bf16.msk.msra.mxu1 %vm973_vm12, %v1260_v14  ;;  %vm427_vm10 = vmor %vm329_vm11, %vm379_vm4  ;;  %vm443_vm12 = vcmp.eq.s32.totalorder %v246_v21, %v1423_v9  ;;  %vm444_vm4 = vcmp.eq.s32.totalorder %v247_v22, %v1423_v9 }
  0x64   : > { %vm428_vm14 = vmor %vm330_vm7, %vm380_vm8 }
  0x65   : > { %vm525_vm1 = vmor %vm427_vm10, %vm477_vm9  ;;  %vm311_vm9 = vcmp.eq.s32.totalorder %v262_v23, %v1419_v5  ;;  %vm361_vm10 = vcmp.eq.s32.totalorder %v262_v23, %v1421_v8 }
  0x66   : > { %vm526_vm0 = vmor %vm428_vm14, %vm478_vm13  ;;  %vm312_vm14 = vcmp.eq.s32.totalorder %v263_v24, %v1419_v5 }
  0x67   : > { %vm989_vm5 = vmpackc.low %vm526_vm0, %vm525_vm1  ;;  %vm362_vm1 = vcmp.eq.s32.totalorder %v263_v24, %v1421_v8 }
  0x68   : > { %990 = vmatpush.bf16.msk.msra.mxu2 %vm989_vm5, %v1260_v14  ;;  %vm393_vm11 = vmor %vm295_vm6, %vm345_vm15  ;;  %vm459_vm5 = vcmp.eq.s32.totalorder %v262_v23, %v1423_v9  ;;  %vm460_vm15 = vcmp.eq.s32.totalorder %v263_v24, %v1423_v9 }
  0x69   : > { %vm394_vm7 = vmor %vm296_vm2, %vm346_vm3 }
  0x6a   : > { %vm491_vm8 = vmor %vm393_vm11, %vm443_vm12  ;;  %vm327_vm12 = vcmp.eq.s32.totalorder %v278_v25, %v1419_v5  ;;  %vm377_vm11 = vcmp.eq.s32.totalorder %v278_v25, %v1421_v8 }
  0x6b   : > { %vm492_vm13 = vmor %vm394_vm7, %vm444_vm4  ;;  %vm328_vm7 = vcmp.eq.s32.totalorder %v279_v26, %v1419_v5 }
  0x6c   : > { %vm959_vm0 = vmpackc.low %vm492_vm13, %vm491_vm8  ;;  %vm378_vm8 = vcmp.eq.s32.totalorder %v279_v26, %v1421_v8 }
  0x6d   : > { %960 = vmatpush.bf16.msk.msra.mxu0 %vm959_vm0, %v1260_v14  ;;  %vm409_vm6 = vmor %vm311_vm9, %vm361_vm10  ;;  %1017 = vmatpush.bf16.msk.msra.mxu3 %vm959_vm0, %v1260_v14  ;;  %vm475_vm9 = vcmp.eq.s32.totalorder %v278_v25, %v1423_v9 }
  0x6e   : > { %vm410_vm2 = vmor %vm312_vm14, %vm362_vm1  ;;  %vm476_vm14 = vcmp.eq.s32.totalorder %v279_v26, %v1423_v9  ;;  %v1261_v26 = vmov 0.0  }
  0x6f   : > { %vm507_vm3 = vmor %vm409_vm6, %vm459_vm5  ;;  %vm293_vm5 = vcmp.eq.s32.totalorder %v244_v27, %v1419_v5  ;;  %vm343_vm6 = vcmp.eq.s32.totalorder %v244_v27, %v1421_v8 }
  0x70   : > { %vm508_vm4 = vmor %vm410_vm2, %vm460_vm15  ;;  %vm294_vm2 = vcmp.eq.s32.totalorder %v245_v28, %v1419_v5 }
  0x71   : > { %vm975_vm13 = vmpackc.low %vm508_vm4, %vm507_vm3  ;;  %vm344_vm3 = vcmp.eq.s32.totalorder %v245_v28, %v1421_v8 }
  0x72   : > { %976 = vmatpush.bf16.msk.msra.mxu1 %vm975_vm13, %v1260_v14  ;;  %vm425_vm10 = vmor %vm327_vm12, %vm377_vm11  ;;  %vm441_vm13 = vcmp.eq.s32.totalorder %v244_v27, %v1423_v9  ;;  %vm442_vm11 = vcmp.eq.s32.totalorder %v245_v28, %v1423_v9 }
  0x73   : > { %vm426_vm1 = vmor %vm328_vm7, %vm378_vm8 }
  0x74   : > { %vm523_vm0 = vmor %vm425_vm10, %vm475_vm9  ;;  %vm309_vm9 = vcmp.eq.s32.totalorder %v260_v29, %v1419_v5  ;;  %vm359_vm10 = vcmp.eq.s32.totalorder %v260_v29, %v1421_v8 }
  0x75   : > { %vm524_vm15 = vmor %vm426_vm1, %vm476_vm14  ;;  %vm310_vm1 = vcmp.eq.s32.totalorder %v261_v30, %v1419_v5 }
  0x76   : > { %vm991_vm4 = vmpackc.low %vm524_vm15, %vm523_vm0  ;;  %vm360_vm0 = vcmp.eq.s32.totalorder %v261_v30, %v1421_v8 }
  0x77   : > { %992 = vmatpush.bf16.msk.msra.mxu2 %vm991_vm4, %v1260_v14  ;;  %vm391_vm12 = vmor %vm293_vm5, %vm343_vm6  ;;  %vm457_vm4 = vcmp.eq.s32.totalorder %v260_v29, %v1423_v9  ;;  %vm458_vm6 = vcmp.eq.s32.totalorder %v261_v30, %v1423_v9 }
  0x78   : > { %vm392_vm7 = vmor %vm294_vm2, %vm344_vm3 }
  0x79   : > { %vm489_vm8 = vmor %vm391_vm12, %vm441_vm13  ;;  %vm325_vm13 = vcmp.eq.s32.totalorder %v276_v31, %v1419_v5  ;;  %vm375_vm12 = vcmp.eq.s32.totalorder %v276_v31, %v1421_v8 }
  0x7a   : > { %vm490_vm14 = vmor %vm392_vm7, %vm442_vm11  ;;  %vm326_vm7 = vcmp.eq.s32.totalorder %v277_v32, %v1419_v5 }
  0x7b   : > { %vm961_vm15 = vmpackc.low %vm490_vm14, %vm489_vm8  ;;  %vm376_vm8 = vcmp.eq.s32.totalorder %v277_v32, %v1421_v8 }
  0x7c   : > { %962 = vmatpush.bf16.msk.msra.mxu0 %vm961_vm15, %v1260_v14  ;;  %vm407_vm5 = vmor %vm309_vm9, %vm359_vm10  ;;  %1018 = vmatpush.bf16.msk.msra.mxu3 %vm961_vm15, %v1260_v14  ;;  %vm473_vm9 = vcmp.eq.s32.totalorder %v276_v31, %v1423_v9 }
  0x7d   : > { %vm408_vm2 = vmor %vm310_vm1, %vm360_vm0  ;;  %vm474_vm1 = vcmp.eq.s32.totalorder %v277_v32, %v1423_v9 }
  0x7e   : > { %vm505_vm3 = vmor %vm407_vm5, %vm457_vm4  ;;  %vm291_vm4 = vcmp.eq.s32.totalorder %v242_v33, %v1419_v5  ;;  %vm341_vm5 = vcmp.eq.s32.totalorder %v242_v33, %v1421_v8 }
  0x7f   : > { %vm506_vm11 = vmor %vm408_vm2, %vm458_vm6  ;;  %vm292_vm2 = vcmp.eq.s32.totalorder %v243_v34, %v1419_v5 }
  0x80   : > { %vm977_vm14 = vmpackc.low %vm506_vm11, %vm505_vm3  ;;  %vm342_vm3 = vcmp.eq.s32.totalorder %v243_v34, %v1421_v8 }
  0x81   : > { %978 = vmatpush.bf16.msk.msra.mxu1 %vm977_vm14, %v1260_v14  ;;  %vm423_vm10 = vmor %vm325_vm13, %vm375_vm12  ;;  %vm439_vm14 = vcmp.eq.s32.totalorder %v242_v33, %v1423_v9  ;;  %vm440_vm12 = vcmp.eq.s32.totalorder %v243_v34, %v1423_v9 }
  0x82   : > { %vm424_vm0 = vmor %vm326_vm7, %vm376_vm8 }
  0x83   : > { %vm521_vm15 = vmor %vm423_vm10, %vm473_vm9  ;;  %vm307_vm9 = vcmp.eq.s32.totalorder %v258_v35, %v1419_v5  ;;  %vm357_vm10 = vcmp.eq.s32.totalorder %v258_v35, %v1421_v8 }
  0x84   : > { %vm522_vm6 = vmor %vm424_vm0, %vm474_vm1  ;;  %vm308_vm0 = vcmp.eq.s32.totalorder %v259_v36, %v1419_v5 }
  0x85   : > { %vm993_vm11 = vmpackc.low %vm522_vm6, %vm521_vm15  ;;  %vm358_vm15 = vcmp.eq.s32.totalorder %v259_v36, %v1421_v8 }
  0x86   : > { %994 = vmatpush.bf16.msk.msra.mxu2 %vm993_vm11, %v1260_v14  ;;  %vm389_vm13 = vmor %vm291_vm4, %vm341_vm5  ;;  %vm455_vm11 = vcmp.eq.s32.totalorder %v258_v35, %v1423_v9  ;;  %vm456_vm5 = vcmp.eq.s32.totalorder %v259_v36, %v1423_v9 }
  0x87   : > { %vm390_vm7 = vmor %vm292_vm2, %vm342_vm3 }
  0x88   : > { %vm487_vm8 = vmor %vm389_vm13, %vm439_vm14  ;;  %vm323_vm14 = vcmp.eq.s32.totalorder %v274_v37, %v1419_v5  ;;  %vm373_vm13 = vcmp.eq.s32.totalorder %v274_v37, %v1421_v8 }
  0x89   : > { %vm488_vm1 = vmor %vm390_vm7, %vm440_vm12  ;;  %vm324_vm7 = vcmp.eq.s32.totalorder %v275_v38, %v1419_v5 }
  0x8a   : > { %vm963_vm6 = vmpackc.low %vm488_vm1, %vm487_vm8  ;;  %vm374_vm8 = vcmp.eq.s32.totalorder %v275_v38, %v1421_v8 }
  0x8b   : > { %964 = vmatpush.bf16.msk.msra.mxu0 %vm963_vm6, %v1260_v14  ;;  %vm405_vm4 = vmor %vm307_vm9, %vm357_vm10  ;;  %1019 = vmatpush.bf16.msk.msra.mxu3 %vm963_vm6, %v1260_v14  ;;  %vm471_vm9 = vcmp.eq.s32.totalorder %v274_v37, %v1423_v9 }
  0x8c   : > { %vm406_vm2 = vmor %vm308_vm0, %vm358_vm15  ;;  %vm472_vm0 = vcmp.eq.s32.totalorder %v275_v38, %v1423_v9 }
  0x8d   : > { %vm503_vm3 = vmor %vm405_vm4, %vm455_vm11  ;;  %vm289_vm11 = vcmp.eq.s32.totalorder %v240_v39, %v1419_v5  ;;  %vm339_vm4 = vcmp.eq.s32.totalorder %v240_v39, %v1421_v8 }
  0x8e   : > { %vm504_vm12 = vmor %vm406_vm2, %vm456_vm5  ;;  %vm290_vm2 = vcmp.eq.s32.totalorder %v241_v40, %v1419_v5 }
  0x8f   : > { %vm979_vm1 = vmpackc.low %vm504_vm12, %vm503_vm3  ;;  %vm340_vm3 = vcmp.eq.s32.totalorder %v241_v40, %v1421_v8 }
  0x90   : > { %980 = vmatpush.bf16.msk.msra.mxu1 %vm979_vm1, %v1260_v14  ;;  %vm421_vm10 = vmor %vm323_vm14, %vm373_vm13  ;;  %vm437_vm1 = vcmp.eq.s32.totalorder %v240_v39, %v1423_v9  ;;  %vm438_vm13 = vcmp.eq.s32.totalorder %v241_v40, %v1423_v9 }
  0x91   : > { %vm422_vm15 = vmor %vm324_vm7, %vm374_vm8 }
  0x92   : > { %vm519_vm6 = vmor %vm421_vm10, %vm471_vm9  ;;  %vm305_vm9 = vcmp.eq.s32.totalorder %v256_v41, %v1419_v5  ;;  %vm355_vm10 = vcmp.eq.s32.totalorder %v256_v41, %v1421_v8 }
  0x93   : > { %vm520_vm5 = vmor %vm422_vm15, %vm472_vm0  ;;  %vm306_vm15 = vcmp.eq.s32.totalorder %v257_v42, %v1419_v5 }
  0x94   : > { %vm995_vm12 = vmpackc.low %vm520_vm5, %vm519_vm6  ;;  %vm356_vm6 = vcmp.eq.s32.totalorder %v257_v42, %v1421_v8 }
  0x95   : > { %996 = vmatpush.bf16.msk.msra.mxu2 %vm995_vm12, %v1260_v14  ;;  %vm387_vm14 = vmor %vm289_vm11, %vm339_vm4  ;;  %vm453_vm12 = vcmp.eq.s32.totalorder %v256_v41, %v1423_v9  ;;  %vm454_vm4 = vcmp.eq.s32.totalorder %v257_v42, %v1423_v9 }
  0x96   : > { %vm388_vm7 = vmor %vm290_vm2, %vm340_vm3 }
  0x97   : > { %vm485_vm8 = vmor %vm387_vm14, %vm437_vm1  ;;  %vm321_vm1 = vcmp.eq.s32.totalorder %v272_v43, %v1419_v5  ;;  %vm371_vm14 = vcmp.eq.s32.totalorder %v272_v43, %v1421_v8 }
  0x98   : > { %vm486_vm0 = vmor %vm388_vm7, %vm438_vm13  ;;  %vm322_vm7 = vcmp.eq.s32.totalorder %v273_v44, %v1419_v5 }
  0x99   : > { %vm965_vm5 = vmpackc.low %vm486_vm0, %vm485_vm8  ;;  %vm372_vm8 = vcmp.eq.s32.totalorder %v273_v44, %v1421_v8 }
  0x9a   : > { %966 = vmatpush.bf16.msk.msra.mxu0 %vm965_vm5, %v1260_v14  ;;  %vm403_vm11 = vmor %vm305_vm9, %vm355_vm10  ;;  %1020 = vmatpush.bf16.msk.msra.mxu3 %vm965_vm5, %v1260_v14  ;;  %vm469_vm9 = vcmp.eq.s32.totalorder %v272_v43, %v1423_v9 }
  0x9b   : > { %vm404_vm2 = vmor %vm306_vm15, %vm356_vm6  ;;  %vm470_vm15 = vcmp.eq.s32.totalorder %v273_v44, %v1423_v9 }
  0x9c   : > { %vm501_vm3 = vmor %vm403_vm11, %vm453_vm12  ;;  %vm287_vm12 = vcmp.eq.s32.totalorder %v1588_v45, %v1419_v5  ;;  %vm337_vm11 = vcmp.eq.s32.totalorder %v1588_v45, %v1421_v8 }
  0x9d   : > { %vm502_vm13 = vmor %vm404_vm2, %vm454_vm4  ;;  %vm288_vm2 = vcmp.eq.s32.totalorder %v1592_v46, %v1419_v5 }
  0x9e   : > { %vm981_vm0 = vmpackc.low %vm502_vm13, %vm501_vm3  ;;  %vm338_vm3 = vcmp.eq.s32.totalorder %v1592_v46, %v1421_v8 }
  0x9f   : > { %982 = vmatpush.bf16.msk.msra.mxu1 %vm981_vm0, %v1260_v14  ;;  %vm419_vm10 = vmor %vm321_vm1, %vm371_vm14  ;;  %vm435_vm14 = vcmp.eq.s32.totalorder %v1588_v45, %v1423_v9 }
  0xa0   : > { %vm420_vm6 = vmor %vm322_vm7, %vm372_vm8  ;;  %vm436_vm7 = vcmp.eq.s32.totalorder %v1592_v46, %v1423_v9 }
  0xa1   : > { %vm517_vm5 = vmor %vm419_vm10, %vm469_vm9  ;;  %vm303_vm9 = vcmp.eq.s32.totalorder %v254_v47, %v1419_v5  ;;  %vm353_vm10 = vcmp.eq.s32.totalorder %v254_v47, %v1421_v8 }
  0xa2   : > { %vm518_vm4 = vmor %vm420_vm6, %vm470_vm15  ;;  %vm304_vm6 = vcmp.eq.s32.totalorder %v255_v48, %v1419_v5 }
  0xa3   : > { %vm997_vm1 = vmpackc.low %vm518_vm4, %vm517_vm5  ;;  %vm354_vm5 = vcmp.eq.s32.totalorder %v255_v48, %v1421_v8 }
  0xa4   : > { %998 = vmatpush.bf16.msk.msra.mxu2 %vm997_vm1, %v1260_v14  ;;  %vm385_vm13 = vmor %vm287_vm12, %vm337_vm11  ;;  %vm451_vm1 = vcmp.eq.s32.totalorder %v254_v47, %v1423_v9  ;;  %vm452_vm11 = vcmp.eq.s32.totalorder %v255_v48, %v1423_v9 }
  0xa5   : > { %vm386_vm8 = vmor %vm288_vm2, %vm338_vm3 }
  0xa6   : > { %vm483_vm0 = vmor %vm385_vm13, %vm435_vm14  ;;  %vm319_vm14 = vcmp.eq.s32.totalorder %v270_v49, %v1419_v5  ;;  %vm369_vm13 = vcmp.eq.s32.totalorder %v270_v49, %v1421_v8 }
  0xa7   : > { %vm484_vm15 = vmor %vm386_vm8, %vm436_vm7  ;;  %vm320_vm8 = vcmp.eq.s32.totalorder %v271_v50, %v1419_v5 }
  0xa8   : > { %vm967_vm4 = vmpackc.low %vm484_vm15, %vm483_vm0  ;;  %vm370_vm0 = vcmp.eq.s32.totalorder %v271_v50, %v1421_v8 }
  0xa9   : > { %968 = vmatpush.bf16.msk.msra.mxu0 %vm967_vm4, %v1260_v14  ;;  %vm401_vm12 = vmor %vm303_vm9, %vm353_vm10  ;;  %1021 = vmatpush.bf16.msk.msra.mxu3 %vm967_vm4, %v1260_v14  ;;  %vm467_vm9 = vcmp.eq.s32.totalorder %v270_v49, %v1423_v9 }
  0xaa   : > { %vm402_vm2 = vmor %vm304_vm6, %vm354_vm5  ;;  %vm468_vm6 = vcmp.eq.s32.totalorder %v271_v50, %v1423_v9 }
  0xab   : > { %vm499_vm3 = vmor %vm401_vm12, %vm451_vm1  ;;  %vm285_vm1 = vcmp.eq.s32.totalorder %v1415_v1, %v1419_v5  ;;  %vm335_vm12 = vcmp.eq.s32.totalorder %v1415_v1, %v1421_v8 }
  0xac   : > { %vm500_vm7 = vmor %vm402_vm2, %vm452_vm11  ;;  %vm286_vm2 = vcmp.eq.s32.totalorder %v1627_v51, %v1419_v5 }
  0xad   : > { %vm983_vm15 = vmpackc.low %vm500_vm7, %vm499_vm3  ;;  %vm336_vm3 = vcmp.eq.s32.totalorder %v1627_v51, %v1421_v8 }
  0xae   : > { %984 = vmatpush.bf16.msk.msra.mxu1 %vm983_vm15, %v1260_v14  ;;  %vm417_vm10 = vmor %vm319_vm14, %vm369_vm13  ;;  %vm433_vm13 = vcmp.eq.s32.totalorder %v1415_v1, %v1423_v9 }
  0xaf   : > { %vm418_vm5 = vmor %vm320_vm8, %vm370_vm0  ;;  %vm434_vm8 = vcmp.eq.s32.totalorder %v1627_v51, %v1423_v9 }
  0xb0   : > { %vm515_vm4 = vmor %vm417_vm10, %vm467_vm9  ;;  %vm301_vm9 = vcmp.eq.s32.totalorder %v252_v52, %v1419_v5  ;;  %vm351_vm10 = vcmp.eq.s32.totalorder %v252_v52, %v1421_v8 }
  0xb1   : > { %vm516_vm11 = vmor %vm418_vm5, %vm468_vm6  ;;  %vm302_vm5 = vcmp.eq.s32.totalorder %v253_v53, %v1419_v5 }
  0xb2   : > { %vm999_vm14 = vmpackc.low %vm516_vm11, %vm515_vm4  ;;  %vm352_vm4 = vcmp.eq.s32.totalorder %v253_v53, %v1421_v8 }
  0xb3   : > { %1000 = vmatpush.bf16.msk.msra.mxu2 %vm999_vm14, %v1260_v14  ;;  %vm383_vm7 = vmor %vm285_vm1, %vm335_vm12  ;;  %vm449_vm12 = vcmp.eq.s32.totalorder %v252_v52, %v1423_v9 }
  0xb4   : > { %vm384_vm0 = vmor %vm286_vm2, %vm336_vm3  ;;  %vm450_vm2 = vcmp.eq.s32.totalorder %v253_v53, %v1423_v9 }
  0xb5   : > { %vm1646_vm15 = vmor %vm383_vm7, %vm433_vm13  ;;  %vm317_vm13 = vcmp.eq.s32.totalorder %v268_v59, %v1419_v5  ;;  %vm367_vm7 = vcmp.eq.s32.totalorder %v268_v59, %v1421_v8 }
  0xb6   : > { %vm482_vm6 = vmor %vm384_vm0, %vm434_vm8  ;;  %vm318_vm0 = vcmp.eq.s32.totalorder %v269_v60, %v1419_v5  ;;  %v942_v5 = vor.u32 %v1011_v4, %v941_v3 }
  0xb7   : > { %vm969_vm1 = vmpackc.low %vm482_vm6, %vm1646_vm15  ;;  %vm368_vm15 = vcmp.eq.s32.totalorder %v269_v60, %v1421_v8  ;;  %v950_v8 = vor.u32 %v1012_v6, %v947_v7 }
  0xb8   : > { %970 = vmatpush.bf16.msk.msra.mxu0 %vm969_vm1, %v1260_v14  ;;  %vm399_vm11 = vmor %vm301_vm9, %vm351_vm10  ;;  %1022 = vmatpush.bf16.msk.msra.mxu3 %vm969_vm1, %v1260_v14  ;;  %vm465_vm10 = vcmp.eq.s32.totalorder %v268_v59, %v1423_v9 }
  0xb9   : > { %vm400_vm3 = vmor %vm302_vm5, %vm352_vm4  ;;  %vm466_vm5 = vcmp.eq.s32.totalorder %v269_v60, %v1423_v9 }
  0xba   : > { %vm497_vm14 = vmor %vm399_vm11, %vm449_vm12 }
  0xbb   : > { %vm498_vm8 = vmor %vm400_vm3, %vm450_vm2  ;;  %697 = vmatmul.bf16.vlgmr.msra.gmra.mxu0 %v934_v61  ;;  %702 = vmatmul.bf16.vlgmr.msra.gmra.mxu3 %v946_v62 }
  0xbc   : > { %vm985_vm9 = vmpackc.low %vm498_vm8, %vm497_vm14 }
  0xbd   : > { %986 = vmatpush.bf16.msk.msra.mxu1 %vm985_vm9, %v1260_v14  ;;  %vm415_vm6 = vmor %vm317_vm13, %vm367_vm7 }
  0xbe   : > { %vm416_vm4 = vmor %vm318_vm0, %vm368_vm15 }
  0xbf   : > { %vm513_vm1 = vmor %vm415_vm6, %vm465_vm10 }
  0xc0   : > { %vm514_vm12 = vmor %vm416_vm4, %vm466_vm5  ;;  %716 = vmatmul.bf16.vlgmr.msra.gmra.mxu1 %v938_v2 }
  0xc1   : > { %vm1001_vm11 = vmpackc.low %vm514_vm12, %vm513_vm1 }
  0xc2   : > { %1002 = vmatpush.bf16.msk.msra.mxu2 %vm1001_vm11, %v1260_v14  ;;  %v1090_v14 = vld [vmem:[%s194_s21] ss:$0 sm:$0xff] }
  0xc3   : > { %vm749_vm2 = vcmp.eq.s32.totalorder %v1627_v51, %v1090_v14  ;;  %vm748_vm3 = vcmp.eq.s32.totalorder %v1415_v1, %v1090_v14  ;;  %vm750_vm14 = vcmp.eq.s32.totalorder %v1588_v45, %v1090_v14  ;;  %vm751_vm13 = vcmp.eq.s32.totalorder %v1592_v46, %v1090_v14 }
  0xc4   : > { %v1004_v27 = vsel %vm749_vm2, 1.0, %v1261_v26  ;;  %v1003_v30 = vsel %vm748_vm3, 1.0, %v1261_v26  ;;  %v1005_v31 = vsel %vm750_vm14, 1.0, %v1261_v26  ;;  %v1006_v38 = vsel %vm751_vm13, 1.0, %v1261_v26 }
  0xc5   : > { %735 = vmatmul.bf16.vlgmr.msra.gmra.mxu2 %v942_v5 }
  0xd0   : > { %721 = vmatmul.bf16.gmra.mxu1 %v950_v8 }
  0xd5   : > { %740 = vmatmul.bf16.gmra.mxu2 %v954_v12 }
 0x138   : > { %v698_v16 = vpop.f32.mrf.mxu0 }
 0x13d   : > { %v717_v9 = vpop.f32.mrf.mxu1 }
 0x13e   : > { %v703_v20 = vpop.f32.mrf.mxu3  ;;  %v718_v21 = vadd.f32 %v717_v9, %v698_v16 }
 0x140   : > { %v700_v19 = vpop.f32.mrf.mxu0 }
 0x145   : > { %v719_v15 = vpop.f32.mrf.mxu1 }
 0x146   : > { %v720_v22 = vadd.f32 %v719_v15, %v700_v19  ;;  %v705_v34 = vpop.f32.mrf.mxu3 }
 0x148   : > { %v736_v13 = vpop.f32.mrf.mxu2 }
 0x149   : > { %v737_v28 = vadd.f32 %v736_v13, %v718_v21 }
 0x14b   : > { %v760_v35 = vmul.f32 %v1003_v30, %v737_v28 }
 0x14d   : > { %v722_v18 = vpop.f32.mrf.mxu1 }
 0x14e   : > { %v723_v23 = vadd.f32 %v722_v18, %v703_v20 }
 0x150   : > { %v738_v17 = vpop.f32.mrf.mxu2 }
 0x151   : > { %v739_v25 = vadd.f32 %v738_v17, %v720_v22 }
 0x153   : > { %v761_v33 = vmul.f32 %v1004_v27, %v739_v25 }
 0x155   : > { %v724_v32 = vpop.f32.mrf.mxu1  ;;  %v764_v39 = vadd.f32 %v761_v33, %v760_v35 }
 0x156   : > { %v725_v37 = vadd.f32 %v724_v32, %v705_v34 }
 0x158   : > { %v741_v24 = vpop.f32.mrf.mxu2 }
 0x159   : > { %v742_v29 = vadd.f32 %v741_v24, %v723_v23 }
 0x15b   : > { %v762_v36 = vmul.f32 %v1005_v31, %v742_v29 }
 0x15d   : > { %v765_v41 = vadd.f32 %v764_v39, %v762_v36 }
 0x160   : > { %v743_v1 = vpop.f32.mrf.mxu2 }
 0x161   : > { %v744_v40 = vadd.f32 %v743_v1, %v725_v37 }
 0x163   : > { %v763_v42 = vmul.f32 %v1006_v38, %v744_v40 }
 0x165   : > { %v766_v43 = vadd.f32 %v765_v41, %v763_v42 }
 0x167   : > { %v767_v44 = vrot.slane %v766_v43, 4 }
 0x169   : > { %v768_v45 = vadd.f32 %v767_v44, %v766_v43 }
 0x16b   : > { %v769_v47 = vrot.slane %v768_v45, 2 }
 0x16d   : > { %v770_v46 = vadd.f32 %v769_v47, %v768_v45 }
 0x16f   : > { %v771_v48 = vrot.slane %v770_v46, 1 }
 0x171   : > { %v772_v49 = vadd.f32 %v771_v48, %v770_v46 }
 0x173   : > { %773 = vst [vmem:[%s233_s25] sm:$0x1] %v772_v49 }
 0x174   : > { %1208 = shalt.err (!%p1205_p8)
}
 0x175   : > { %1031 = dma.vmem_to_hbm [thread:$0]  (%p1345_p13), %s786_s16, 16, %s788_s22, %s775_s23  }
 0x176 PF: > { %p1051_p10 = scmp.ge.s32.totalorder %s1255_s15, 2  ;;  %s799_s11 = sand.u32 1, %s1243_s12  }
 0x177   : > { %s800_s6 = scalar_lea.sflag [#allocation4], %s799_s11 }
 0x178   : > { %p1045_p9 = pnand %p1051_p10, %p1351_p4 }
 0x17a   : > { %p1046_p11 = pneg %p1045_p9 }
 0x17c   : > { %1238 = dma.done.wait (%p1046_p11), %s800_s6, 16  }
 0x17d   : > { %1240 = vsyncadd (%p1046_p11), %s800_s6, 4294967280  ;;  %s1724_s17 = sld [smem:[#allocation13_spill]]  ;;  %p19_p0 = scmp.ge.s32.totalorder %s1321_s26, 5  }
 0x17e   : > { %s1725_s12 = smov %s1247_s13  ;;  %s1726_s13 = smov %s1251_s14 }
 0x17f   : > { %s1728_s15 = smov %s1321_s26  ;;  %21 = sbr.rel (!%p19_p0) target bundleno = 9 (0x9), region = 94 }
 0x183   : > { %s1727_s14 = smov %s1724_s17 }
 0x184   :  { %805 = vsyncpa [#allocation3], 1 }
 0x185   :  { %807 = vsyncpa [#allocation3 + $0x1], 1 }
 0x186   :  { %808 = vsyncpa [#allocation6], 1 }
 0x187   :  { %810 = vsyncpa [#allocation6 + $0x1], 1 }
 0x188   :  { %811 = vsyncpa [#allocation4], 1 }
 0x189   :  { %813 = vsyncpa [#allocation4 + $0x1], 1 }

// kernel: tpu_custom_call.1
= control target key start
LH: loop header
LB: loop body
LE: loop exit
PB: predicated region body
PF: predicated region fallthrough
CT: control target
= control target key end

     0   :  { %s1709_s0 = inlined_call_operand.hbm [shape: s32[1,384], index: 0, kind: input, shape index: {}]   ;;  %s1710_s1 = inlined_call_operand.hbm [shape: s32[1,384], index: 1, kind: input, shape index: {}]   ;;  %s1711_s2 = inlined_call_operand.hbm [shape: bf16[32,384], index: 2, kind: input, shape index: {}]   ;;  %s1712_s3 = inlined_call_operand.hbm [shape: f32[1,384], index: 3, kind: output, shape index: {}]  }
   0x1   :  { %1713 = sst [smem:[#allocation14_spill]] %s1711_s2 }
   0x2   :  { %8 = vsyncpa [#allocation3], 0 }
   0x3   :  { %10 = vsyncpa [#allocation3 + $0x1], 0 }
   0x4   :  { %11 = vsyncpa [#allocation6], 0 }
   0x5   :  { %13 = vsyncpa [#allocation6 + $0x1], 0 }
   0x6   :  { %14 = vsyncpa [#allocation4], 0 }
   0x7   :  { %16 = vsyncpa [#allocation4 + $0x1], 0  ;;  %s1282_s12 = smov 0   ;;  %s1284_s13 = smov 0  }
   0x8   :  { %s1286_s14 = smov 0   ;;  %s1288_s15 = smov 0  }
   0x9 LB: > { %s1714_s2 = sld [smem:[#allocation14_spill]]  ;;  %s1306_s19 = sadd.s32 4294967295, %s1255_s15   ;;  %s1255_s15 = sphi %s1288_s15, %s1728_s15   ;;  %s1251_s14 = sphi %s1286_s14, %s1727_s14   ;;  %s1247_s13 = sphi %s1284_s13, %s1726_s13   ;;  %s1243_s12 = sphi %s1282_s12, %s1725_s12  }
   0xa   : > { %p878_p0 = scmp.ge.s32.totalorder %s1255_s15, 1  ;;  %p43_p1 = scmp.eq.s32.totalorder %s1306_s19, 0 }
   0xb   : > { %p126_p2 = scmp.lt.s32.totalorder %s1255_s15, 4  ;;  %s1257_s21 = smov [#allocation7]  }
   0xc   : > { %s139_s22 = sshll.u32 %s1257_s21, 4  ;;  %s1258_s23 = smov 192   ;;  %s140_s22 = int_to_ptr.vmem [resolvable:$true] %s139_s22 }
   0xd   : > { %p1311_p3 = pnand %p878_p0, %p126_p2  ;;  %s1259_s24 = smov 12  }
   0xe   : > { %s877_s25 = sadd.s32 4294967294, %s1255_s15   ;;  %s1321_s26 = sadd.s32 1, %s1255_s15  }
   0xf   : > { %s137_s18 = sshll.u32 %s1714_s2, 4  ;;  %p1033_p4 = pneg %p1311_p3  ;;  %s138_s18 = int_to_ptr.hbm [resolvable:$true] %s137_s18 }
  0x10   : > { %s29_s27 = sadd.s32 1, %s1251_s14  ;;  %s26_s28 = ssub.s32 %s1255_s15, %s1321_s26 }
  0x11   : > { %p1034_p5 = pnand %p1033_p4, %p43_p1  ;;  %p36_p6 = scmp.ne.s32.totalorder %s1251_s14, %s1247_s13 }
  0x12   : > { %p27_p7 = scmp.eq.s32.totalorder %s26_s28, 0  ;;  %p37_p8 = scmp.eq.s32.totalorder %s1255_s15, 0 }
  0x13   : > { %1036 = dma.hbm_to_vmem [thread:$0]  (!%p1034_p5), %s138_s18, 768, %s140_s22, [#allocation6], %s1258_s23, %s1258_s23, %s1259_s24  }
  0x14   : > { %p42_p9 = scmp.ne.s32.totalorder %s1247_s13, %s1243_s12  ;;  %p113_p10 = scmp.eq.s32.totalorder %s1306_s19, 2 }
  0x15   : > { %s1333_s29 = scalar_select %p27_p7, %s1251_s14, %s29_s27  }
  0x16   : > { %p1335_p11 = por %p37_p8, %p36_p6  ;;  %p1341_p12 = por %p43_p1, %p42_p9 }
  0x17   : > { %1716 = sst [smem:[#allocation13_spill]] %s1333_s29  ;;  %p1345_p13 = por %p113_p10, %p36_p6 }
  0x18   : > { %p119_p0 = scmp.eq.s32.totalorder %s877_s25, 2  ;;  %p1049_p2 = scmp.lt.s32.totalorder %s1255_s15, 3 }
  0x19   : > { %s153_s6 = sand.u32 1, %s1251_s14   ;;  %s159_s10 = scalar_lea.hbm %s1709_s0, %s1255_s15 }
  0x1a   : > { %p1351_p4 = por %p119_p0, %p42_p9  ;;  %s161_s11 = sshll.u32 %s159_s10, 4  ;;  %s162_s11 = int_to_ptr.hbm [resolvable:$true] %s161_s11 }
  0x1b   : > { %s156_s16 = scalar_lea.vmem [#allocation2], %s153_s6  ;;  %p1361_p5 = pnand %p1049_p2, %p1335_p11 }
  0x1c   : > { %s163_s17 = sshll.u32 %s156_s16, 4  ;;  %s170_s21 = sand.u32 1, %s1255_s15   ;;  %s164_s17 = int_to_ptr.vmem [resolvable:$true] %s163_s17 }
  0x1d   : > { %s176_s24 = scalar_lea.hbm %s1710_s1, %s1255_s15  ;;  %s154_s25 = scalar_lea.sflag [#allocation3], %s153_s6 }
  0x1e   : > { %s1121_s27 = sshra.s32 %s162_s11, 4  ;;  %p1125_p7 = pneg %p1361_p5  ;;  %s1122_s27 = int_to_ptr.hbm [resolvable:$true] %s1121_s27 }
  0x1f   : > { %s1123_s28 = scalar_lea.hbm %s1122_s27, 1  ;;  %s1128_s9 = scalar_lea.hbm %s1709_s0, 3 }
  0x20   : > { %p1124_p6 = scmp.ne.s32.totalorder %s1122_s27, %s1123_s28  ;;  %p1129_p10 = scmp.lt.s32.totalorder %s1122_s27, %s1709_s0 }
  0x21   : > { %p1130_p11 = scmp.lt.s32.totalorder %s1128_s9, %s1123_s28 }
  0x22   : > { %p1126_p8 = pnand %p1125_p7, %p1124_p6 }
  0x23   : > { %p1131_p0 = por %p1130_p11, %p1129_p10 }
  0x24   : > { %p1127_p9 = pneg %p1126_p8 }
  0x26   : > { %p1132_p2 = pnand %p1131_p0, %p1127_p9 }
  0x28   : > { %1135 = shalt.err (!%p1132_p2)
}
  0x29   : > { %1040 = dma.hbm_to_vmem [thread:$0]  (!%p1361_p5), %s162_s11, 16, %s164_s17, %s154_s25  }
  0x2a   : > { %s178_s22 = sshll.u32 %s176_s24, 4  ;;  %s173_s23 = scalar_lea.vmem [#allocation5], %s153_s6  ;;  %s179_s22 = int_to_ptr.hbm [resolvable:$true] %s178_s22 }
  0x2b   : > { %s180_s2 = sshll.u32 %s173_s23, 4  ;;  %s171_s29 = scalar_lea.sflag [#allocation6], %s170_s21  ;;  %s181_s2 = int_to_ptr.vmem [resolvable:$true] %s180_s2 }
  0x2c   : > { %s1151_s30 = sshra.s32 %s179_s22, 4  ;;  %s1158_s9 = scalar_lea.hbm %s1710_s1, 3  ;;  %s1152_s30 = int_to_ptr.hbm [resolvable:$true] %s1151_s30 }
  0x2d   : > { %s1153_s8 = scalar_lea.hbm %s1152_s30, 1  ;;  %p1159_p9 = scmp.lt.s32.totalorder %s1152_s30, %s1710_s1 }
  0x2e   : > { %p1154_p6 = scmp.ne.s32.totalorder %s1152_s30, %s1153_s8  ;;  %p1160_p11 = scmp.lt.s32.totalorder %s1158_s9, %s1153_s8 }
  0x30   : > { %p1156_p8 = pnand %p1154_p6, %p1125_p7  ;;  %p1161_p0 = por %p1160_p11, %p1159_p9 }
  0x32   : > { %p1157_p10 = pneg %p1156_p8 }
  0x34   : > { %p1162_p2 = pnand %p1161_p0, %p1157_p10 }
  0x36   : > { %1165 = shalt.err (!%p1162_p2)
}
  0x37   : > { %1043 = dma.hbm_to_vmem [thread:$0]  (!%p1361_p5), %s179_s22, 16, %s181_s2, %s171_s29  }
  0x38   : > { %189 = sbr.rel (%p1311_p3) target bundleno = 374 (0x176), region = 32  ;;  %s1397_s6 = sand.u32 (!%p1311_p3), 1, %s1247_s13  }
  0x39   : > { %s192_s17 = scalar_lea.sflag (!%p1311_p3), [#allocation3], %s1397_s6  ;;  %s194_s21 = scalar_lea.vmem (!%p1311_p3), [#allocation2], %s1397_s6 }
  0x3d   : > { %1226 = dma.done.wait (%p1341_p12), %s192_s17, 16  }
  0x3e   : > { %1228 = vsyncadd (%p1341_p12), %s192_s17, 4294967280  ;;  %s200_s2 = sand.u32 1, %s1306_s19   ;;  %s203_s20 = scalar_lea.vmem [#allocation5], %s1397_s6 }
  0x3f   : > { %s201_s29 = scalar_lea.sflag [#allocation6], %s200_s2 }
  0x40   : > { %1230 = dma.done.wait (%p1341_p12), %s201_s29, 16  }
  0x41   : > { %1232 = vsyncadd (%p1341_p12), %s201_s29, 4294967280 }
  0x42   : > { %1234 = dma.done.wait (%p43_p1), [#allocation6], 768  }
  0x43   : > { %1236 = vsyncadd (%p43_p1), [#allocation6], 4294966528  ;;  %v235_v0 = vlaneseq  ;;  %v234_v4 = vld [vmem:[%s203_s20] sm:$0x1]  ;;  %v1260_v14 = vmov 1.0|1.0   ;;  %s783_s24 = scalar_lea.hbm %s1712_s3, %s1306_s19 }
  0x44   : > { %v1419_v5 = vld [vmem:[%s203_s20] ss:$0 sm:$0xff]  ;;  %v333_v6 = vadd.s32 128, %v234_v4  ;;  %v431_v7 = vadd.s32 256, %v234_v4  ;;  %v933_v54 = vld [vmem:[#allocation7] sm:$0xf] }
  0x45   : > { %v1415_v1 = vshrl.u32 %v235_v0, 7  ;;  %v1010_v55 = vld [vmem:[#allocation7 + $0x8] sm:$0xf0]  ;;  %v945_v56 = vld [vmem:[#allocation7 + $0x18] sm:$0xf]  ;;  %s233_s25 = scalar_lea.vmem [#allocation8], %s1397_s6 }
  0x46   : > { %v1421_v8 = vperm.slane %v333_v6, 0  ;;  %v1423_v9 = vperm.slane %v431_v7, 0  ;;  %v1013_v57 = vld [vmem:[#allocation7 + $0x20] sm:$0xf0]  ;;  %v934_v61 = vor.u32 %v1010_v55, %v933_v54  ;;  %v935_v0 = vld [vmem:[#allocation7 + $0xc] sm:$0xf0] }
  0x47   : > { %v250_v2 = vadd.s32 112, %v1415_v1  ;;  %v251_v3 = vadd.s32 120, %v1415_v1  ;;  %v266_v10 = vadd.s32 240, %v1415_v1  ;;  %v267_v11 = vadd.s32 248, %v1415_v1  ;;  %v1009_v63 = vld [vmem:[#allocation7 + $0x4] sm:$0xf] }
  0x48   : > { %v282_v12 = vadd.s32 368, %v1415_v1  ;;  %v283_v13 = vadd.s32 376, %v1415_v1  ;;  %v248_v15 = vadd.s32 96, %v1415_v1  ;;  %v249_v16 = vadd.s32 104, %v1415_v1  ;;  %v1011_v4 = vld [vmem:[#allocation7 + $0x10] sm:$0xf0] }
  0x49   : > { %vm299_vm0 = vcmp.eq.s32.totalorder %v250_v2, %v1419_v5  ;;  %vm300_vm1 = vcmp.eq.s32.totalorder %v251_v3, %v1419_v5  ;;  %vm349_vm2 = vcmp.eq.s32.totalorder %v250_v2, %v1421_v8  ;;  %vm350_vm3 = vcmp.eq.s32.totalorder %v251_v3, %v1421_v8  ;;  %v1012_v6 = vld [vmem:[#allocation7 + $0x1c] sm:$0xf]  ;;  %v947_v7 = vld [vmem:[#allocation7 + $0x24] sm:$0xf0]  ;;  %s785_s16 = sshll.u32 %s233_s25, 4  ;;  %s787_s22 = sshll.u32 %s783_s24, 4  ;;  %s786_s16 = int_to_ptr.vmem [resolvable:$true] %s785_s16  ;;  %s788_s22 = int_to_ptr.hbm [resolvable:$true] %s787_s22 }
  0x4a   : > { %vm447_vm4 = vcmp.eq.s32.totalorder %v250_v2, %v1423_v9  ;;  %vm397_vm5 = vmor %vm299_vm0, %vm349_vm2  ;;  %vm448_vm6 = vcmp.eq.s32.totalorder %v251_v3, %v1423_v9  ;;  %vm315_vm9 = vcmp.eq.s32.totalorder %v266_v10, %v1419_v5  ;;  %vm365_vm10 = vcmp.eq.s32.totalorder %v266_v10, %v1421_v8  ;;  %v941_v3 = vld [vmem:[#allocation7 + $0x8] sm:$0xf]  ;;  %s775_s23 = scalar_lea.sflag [#allocation4], %s1397_s6  ;;  %s1195_s30 = sshra.s32 %s788_s22, 4  ;;  %s1196_s30 = int_to_ptr.hbm [resolvable:$true] %s1195_s30 }
  0x4b   : > { %vm398_vm7 = vmor %vm300_vm1, %vm350_vm3  ;;  %vm316_vm12 = vcmp.eq.s32.totalorder %v267_v11, %v1419_v5  ;;  %vm366_vm13 = vcmp.eq.s32.totalorder %v267_v11, %v1421_v8  ;;  %vm463_vm15 = vcmp.eq.s32.totalorder %v266_v10, %v1423_v9  ;;  %vm464_vm1 = vcmp.eq.s32.totalorder %v267_v11, %v1423_v9  ;;  %v953_v10 = vld [vmem:[#allocation7 + $0x20] sm:$0xf]  ;;  %v1014_v11 = vld [vmem:[#allocation7 + $0x28] sm:$0xf0]  ;;  %s1197_s8 = scalar_lea.hbm %s1196_s30, 1  ;;  %s1201_s19 = scalar_lea.hbm %s1712_s3, 3 }
  0x4c   : > { %vm495_vm8 = vmor %vm397_vm5, %vm447_vm4  ;;  %vm331_vm4 = vcmp.eq.s32.totalorder %v282_v12, %v1419_v5  ;;  %vm381_vm5 = vcmp.eq.s32.totalorder %v282_v12, %v1421_v8  ;;  %v264_v17 = vadd.s32 224, %v1415_v1  ;;  %v265_v18 = vadd.s32 232, %v1415_v1  ;;  %p1198_p1 = scmp.ne.s32.totalorder %s1196_s30, %s1197_s8  ;;  %p1202_p5 = scmp.lt.s32.totalorder %s1196_s30, %s1712_s3 }
  0x4d   : > { %vm496_vm11 = vmor %vm398_vm7, %vm448_vm6  ;;  %vm332_vm7 = vcmp.eq.s32.totalorder %v283_v13, %v1419_v5  ;;  %v280_v19 = vadd.s32 352, %v1415_v1  ;;  %v281_v20 = vadd.s32 360, %v1415_v1  ;;  %v246_v21 = vadd.s32 80, %v1415_v1  ;;  %p1203_p7 = scmp.lt.s32.totalorder %s1201_s19, %s1197_s8 }
  0x4e   : > { %vm955_vm14 = vmpackc.low %vm496_vm11, %vm495_vm8  ;;  %vm382_vm8 = vcmp.eq.s32.totalorder %v283_v13, %v1421_v8  ;;  %v247_v22 = vadd.s32 88, %v1415_v1  ;;  %v262_v23 = vadd.s32 208, %v1415_v1  ;;  %v263_v24 = vadd.s32 216, %v1415_v1  ;;  %p1199_p3 = pnand %p1198_p1, %p1345_p13 }
  0x4f   : > { %956 = vmatpush.bf16.msk.msra.mxu0 %vm955_vm14, %v1260_v14  ;;  %vm413_vm0 = vmor %vm315_vm9, %vm365_vm10  ;;  %1015 = vmatpush.bf16.msk.msra.mxu3 %vm955_vm14, %v1260_v14  ;;  %vm479_vm9 = vcmp.eq.s32.totalorder %v282_v12, %v1423_v9  ;;  %v278_v25 = vadd.s32 336, %v1415_v1  ;;  %v279_v26 = vadd.s32 344, %v1415_v1  ;;  %v244_v27 = vadd.s32 64, %v1415_v1  ;;  %p1204_p6 = por %p1203_p7, %p1202_p5 }
  0x50   : > { %vm414_vm2 = vmor %vm316_vm12, %vm366_vm13  ;;  %vm480_vm12 = vcmp.eq.s32.totalorder %v283_v13, %v1423_v9  ;;  %v245_v28 = vadd.s32 72, %v1415_v1  ;;  %v260_v29 = vadd.s32 192, %v1415_v1  ;;  %v261_v30 = vadd.s32 200, %v1415_v1  ;;  %p1200_p12 = pneg %p1199_p3 }
  0x51   : > { %vm511_vm3 = vmor %vm413_vm0, %vm463_vm15  ;;  %vm297_vm15 = vcmp.eq.s32.totalorder %v248_v15, %v1419_v5  ;;  %vm347_vm0 = vcmp.eq.s32.totalorder %v248_v15, %v1421_v8  ;;  %v276_v31 = vadd.s32 320, %v1415_v1  ;;  %v277_v32 = vadd.s32 328, %v1415_v1 }
  0x52   : > { %vm512_vm6 = vmor %vm414_vm2, %vm464_vm1  ;;  %vm298_vm2 = vcmp.eq.s32.totalorder %v249_v16, %v1419_v5  ;;  %v242_v33 = vadd.s32 48, %v1415_v1  ;;  %v243_v34 = vadd.s32 56, %v1415_v1  ;;  %v258_v35 = vadd.s32 176, %v1415_v1  ;;  %p1205_p8 = pnand %p1204_p6, %p1200_p12 }
  0x53   : > { %vm971_vm11 = vmpackc.low %vm512_vm6, %vm511_vm3  ;;  %vm348_vm3 = vcmp.eq.s32.totalorder %v249_v16, %v1421_v8  ;;  %v259_v36 = vadd.s32 184, %v1415_v1  ;;  %v274_v37 = vadd.s32 304, %v1415_v1  ;;  %v275_v38 = vadd.s32 312, %v1415_v1 }
  0x54   : > { %972 = vmatpush.bf16.msk.msra.mxu1 %vm971_vm11, %v1260_v14  ;;  %vm429_vm10 = vmor %vm331_vm4, %vm381_vm5  ;;  %vm445_vm11 = vcmp.eq.s32.totalorder %v248_v15, %v1423_v9  ;;  %vm446_vm5 = vcmp.eq.s32.totalorder %v249_v16, %v1423_v9  ;;  %v240_v39 = vadd.s32 32, %v1415_v1  ;;  %v241_v40 = vadd.s32 40, %v1415_v1 }
  0x55   : > { %vm430_vm13 = vmor %vm332_vm7, %vm382_vm8  ;;  %v256_v41 = vadd.s32 160, %v1415_v1  ;;  %v257_v42 = vadd.s32 168, %v1415_v1  ;;  %v272_v43 = vadd.s32 288, %v1415_v1  ;;  %v273_v44 = vadd.s32 296, %v1415_v1 }
  0x56   : > { %vm527_vm14 = vmor %vm429_vm10, %vm479_vm9  ;;  %vm313_vm9 = vcmp.eq.s32.totalorder %v264_v17, %v1419_v5  ;;  %vm363_vm10 = vcmp.eq.s32.totalorder %v264_v17, %v1421_v8  ;;  %v1588_v45 = vadd.s32 16, %v1415_v1  ;;  %v1592_v46 = vadd.s32 24, %v1415_v1 }
  0x57   : > { %vm528_vm1 = vmor %vm430_vm13, %vm480_vm12  ;;  %vm314_vm13 = vcmp.eq.s32.totalorder %v265_v18, %v1419_v5  ;;  %v254_v47 = vadd.s32 144, %v1415_v1  ;;  %v255_v48 = vadd.s32 152, %v1415_v1  ;;  %v270_v49 = vadd.s32 272, %v1415_v1 }
  0x58   : > { %vm987_vm6 = vmpackc.low %vm528_vm1, %vm527_vm14  ;;  %vm364_vm14 = vcmp.eq.s32.totalorder %v265_v18, %v1421_v8  ;;  %v271_v50 = vadd.s32 280, %v1415_v1  ;;  %v1627_v51 = vadd.s32 8, %v1415_v1  ;;  %v252_v52 = vadd.s32 128, %v1415_v1 }
  0x59   : > { %988 = vmatpush.bf16.msk.msra.mxu2 %vm987_vm6, %v1260_v14  ;;  %vm395_vm4 = vmor %vm297_vm15, %vm347_vm0  ;;  %vm461_vm6 = vcmp.eq.s32.totalorder %v264_v17, %v1423_v9  ;;  %vm462_vm0 = vcmp.eq.s32.totalorder %v265_v18, %v1423_v9  ;;  %v253_v53 = vadd.s32 136, %v1415_v1  ;;  %v268_v59 = vadd.s32 256, %v1415_v1 }
  0x5a   : > { %vm396_vm7 = vmor %vm298_vm2, %vm348_vm3  ;;  %v269_v60 = vadd.s32 264, %v1415_v1  ;;  %v946_v62 = vor.u32 %v1013_v57, %v945_v56  ;;  %v938_v2 = vor.u32 %v1009_v63, %v935_v0  ;;  %v954_v12 = vor.u32 %v1014_v11, %v953_v10 }
  0x5b   : > { %vm493_vm8 = vmor %vm395_vm4, %vm445_vm11  ;;  %vm329_vm11 = vcmp.eq.s32.totalorder %v280_v19, %v1419_v5  ;;  %vm379_vm4 = vcmp.eq.s32.totalorder %v280_v19, %v1421_v8 }
  0x5c   : > { %vm494_vm12 = vmor %vm396_vm7, %vm446_vm5  ;;  %vm330_vm7 = vcmp.eq.s32.totalorder %v281_v20, %v1419_v5 }
  0x5d   : > { %vm957_vm1 = vmpackc.low %vm494_vm12, %vm493_vm8  ;;  %vm380_vm8 = vcmp.eq.s32.totalorder %v281_v20, %v1421_v8 }
  0x5e   : > { %958 = vmatpush.bf16.msk.msra.mxu0 %vm957_vm1, %v1260_v14  ;;  %vm411_vm15 = vmor %vm313_vm9, %vm363_vm10  ;;  %1016 = vmatpush.bf16.msk.msra.mxu3 %vm957_vm1, %v1260_v14  ;;  %vm477_vm9 = vcmp.eq.s32.totalorder %v280_v19, %v1423_v9 }
  0x5f   : > { %vm412_vm2 = vmor %vm314_vm13, %vm364_vm14  ;;  %vm478_vm13 = vcmp.eq.s32.totalorder %v281_v20, %v1423_v9 }
  0x60   : > { %vm509_vm3 = vmor %vm411_vm15, %vm461_vm6  ;;  %vm295_vm6 = vcmp.eq.s32.totalorder %v246_v21, %v1419_v5  ;;  %vm345_vm15 = vcmp.eq.s32.totalorder %v246_v21, %v1421_v8 }
  0x61   : > { %vm510_vm5 = vmor %vm412_vm2, %vm462_vm0  ;;  %vm296_vm2 = vcmp.eq.s32.totalorder %v247_v22, %v1419_v5 }
  0x62   : > { %vm973_vm12 = vmpackc.low %vm510_vm5, %vm509_vm3  ;;  %vm346_vm3 = vcmp.eq.s32.totalorder %v247_v22, %v1421_v8 }
  0x63   : > { %974 = vmatpush.bf16.msk.msra.mxu1 %vm973_vm12, %v1260_v14  ;;  %vm427_vm10 = vmor %vm329_vm11, %vm379_vm4  ;;  %vm443_vm12 = vcmp.eq.s32.totalorder %v246_v21, %v1423_v9  ;;  %vm444_vm4 = vcmp.eq.s32.totalorder %v247_v22, %v1423_v9 }
  0x64   : > { %vm428_vm14 = vmor %vm330_vm7, %vm380_vm8 }
  0x65   : > { %vm525_vm1 = vmor %vm427_vm10, %vm477_vm9  ;;  %vm311_vm9 = vcmp.eq.s32.totalorder %v262_v23, %v1419_v5  ;;  %vm361_vm10 = vcmp.eq.s32.totalorder %v262_v23, %v1421_v8 }
  0x66   : > { %vm526_vm0 = vmor %vm428_vm14, %vm478_vm13  ;;  %vm312_vm14 = vcmp.eq.s32.totalorder %v263_v24, %v1419_v5 }
  0x67   : > { %vm989_vm5 = vmpackc.low %vm526_vm0, %vm525_vm1  ;;  %vm362_vm1 = vcmp.eq.s32.totalorder %v263_v24, %v1421_v8 }
  0x68   : > { %990 = vmatpush.bf16.msk.msra.mxu2 %vm989_vm5, %v1260_v14  ;;  %vm393_vm11 = vmor %vm295_vm6, %vm345_vm15  ;;  %vm459_vm5 = vcmp.eq.s32.totalorder %v262_v23, %v1423_v9  ;;  %vm460_vm15 = vcmp.eq.s32.totalorder %v263_v24, %v1423_v9 }
  0x69   : > { %vm394_vm7 = vmor %vm296_vm2, %vm346_vm3 }
  0x6a   : > { %vm491_vm8 = vmor %vm393_vm11, %vm443_vm12  ;;  %vm327_vm12 = vcmp.eq.s32.totalorder %v278_v25, %v1419_v5  ;;  %vm377_vm11 = vcmp.eq.s32.totalorder %v278_v25, %v1421_v8 }
  0x6b   : > { %vm492_vm13 = vmor %vm394_vm7, %vm444_vm4  ;;  %vm328_vm7 = vcmp.eq.s32.totalorder %v279_v26, %v1419_v5 }
  0x6c   : > { %vm959_vm0 = vmpackc.low %vm492_vm13, %vm491_vm8  ;;  %vm378_vm8 = vcmp.eq.s32.totalorder %v279_v26, %v1421_v8 }
  0x6d   : > { %960 = vmatpush.bf16.msk.msra.mxu0 %vm959_vm0, %v1260_v14  ;;  %vm409_vm6 = vmor %vm311_vm9, %vm361_vm10  ;;  %1017 = vmatpush.bf16.msk.msra.mxu3 %vm959_vm0, %v1260_v14  ;;  %vm475_vm9 = vcmp.eq.s32.totalorder %v278_v25, %v1423_v9 }
  0x6e   : > { %vm410_vm2 = vmor %vm312_vm14, %vm362_vm1  ;;  %vm476_vm14 = vcmp.eq.s32.totalorder %v279_v26, %v1423_v9  ;;  %v1261_v26 = vmov 0.0  }
  0x6f   : > { %vm507_vm3 = vmor %vm409_vm6, %vm459_vm5  ;;  %vm293_vm5 = vcmp.eq.s32.totalorder %v244_v27, %v1419_v5  ;;  %vm343_vm6 = vcmp.eq.s32.totalorder %v244_v27, %v1421_v8 }
  0x70   : > { %vm508_vm4 = vmor %vm410_vm2, %vm460_vm15  ;;  %vm294_vm2 = vcmp.eq.s32.totalorder %v245_v28, %v1419_v5 }
  0x71   : > { %vm975_vm13 = vmpackc.low %vm508_vm4, %vm507_vm3  ;;  %vm344_vm3 = vcmp.eq.s32.totalorder %v245_v28, %v1421_v8 }
  0x72   : > { %976 = vmatpush.bf16.msk.msra.mxu1 %vm975_vm13, %v1260_v14  ;;  %vm425_vm10 = vmor %vm327_vm12, %vm377_vm11  ;;  %vm441_vm13 = vcmp.eq.s32.totalorder %v244_v27, %v1423_v9  ;;  %vm442_vm11 = vcmp.eq.s32.totalorder %v245_v28, %v1423_v9 }
  0x73   : > { %vm426_vm1 = vmor %vm328_vm7, %vm378_vm8 }
  0x74   : > { %vm523_vm0 = vmor %vm425_vm10, %vm475_vm9  ;;  %vm309_vm9 = vcmp.eq.s32.totalorder %v260_v29, %v1419_v5  ;;  %vm359_vm10 = vcmp.eq.s32.totalorder %v260_v29, %v1421_v8 }
  0x75   : > { %vm524_vm15 = vmor %vm426_vm1, %vm476_vm14  ;;  %vm310_vm1 = vcmp.eq.s32.totalorder %v261_v30, %v1419_v5 }
  0x76   : > { %vm991_vm4 = vmpackc.low %vm524_vm15, %vm523_vm0  ;;  %vm360_vm0 = vcmp.eq.s32.totalorder %v261_v30, %v1421_v8 }
  0x77   : > { %992 = vmatpush.bf16.msk.msra.mxu2 %vm991_vm4, %v1260_v14  ;;  %vm391_vm12 = vmor %vm293_vm5, %vm343_vm6  ;;  %vm457_vm4 = vcmp.eq.s32.totalorder %v260_v29, %v1423_v9  ;;  %vm458_vm6 = vcmp.eq.s32.totalorder %v261_v30, %v1423_v9 }
  0x78   : > { %vm392_vm7 = vmor %vm294_vm2, %vm344_vm3 }
  0x79   : > { %vm489_vm8 = vmor %vm391_vm12, %vm441_vm13  ;;  %vm325_vm13 = vcmp.eq.s32.totalorder %v276_v31, %v1419_v5  ;;  %vm375_vm12 = vcmp.eq.s32.totalorder %v276_v31, %v1421_v8 }
  0x7a   : > { %vm490_vm14 = vmor %vm392_vm7, %vm442_vm11  ;;  %vm326_vm7 = vcmp.eq.s32.totalorder %v277_v32, %v1419_v5 }
  0x7b   : > { %vm961_vm15 = vmpackc.low %vm490_vm14, %vm489_vm8  ;;  %vm376_vm8 = vcmp.eq.s32.totalorder %v277_v32, %v1421_v8 }
  0x7c   : > { %962 = vmatpush.bf16.msk.msra.mxu0 %vm961_vm15, %v1260_v14  ;;  %vm407_vm5 = vmor %vm309_vm9, %vm359_vm10  ;;  %1018 = vmatpush.bf16.msk.msra.mxu3 %vm961_vm15, %v1260_v14  ;;  %vm473_vm9 = vcmp.eq.s32.totalorder %v276_v31, %v1423_v9 }
  0x7d   : > { %vm408_vm2 = vmor %vm310_vm1, %vm360_vm0  ;;  %vm474_vm1 = vcmp.eq.s32.totalorder %v277_v32, %v1423_v9 }
  0x7e   : > { %vm505_vm3 = vmor %vm407_vm5, %vm457_vm4  ;;  %vm291_vm4 = vcmp.eq.s32.totalorder %v242_v33, %v1419_v5  ;;  %vm341_vm5 = vcmp.eq.s32.totalorder %v242_v33, %v1421_v8 }
  0x7f   : > { %vm506_vm11 = vmor %vm408_vm2, %vm458_vm6  ;;  %vm292_vm2 = vcmp.eq.s32.totalorder %v243_v34, %v1419_v5 }
  0x80   : > { %vm977_vm14 = vmpackc.low %vm506_vm11, %vm505_vm3  ;;  %vm342_vm3 = vcmp.eq.s32.totalorder %v243_v34, %v1421_v8 }
  0x81   : > { %978 = vmatpush.bf16.msk.msra.mxu1 %vm977_vm14, %v1260_v14  ;;  %vm423_vm10 = vmor %vm325_vm13, %vm375_vm12  ;;  %vm439_vm14 = vcmp.eq.s32.totalorder %v242_v33, %v1423_v9  ;;  %vm440_vm12 = vcmp.eq.s32.totalorder %v243_v34, %v1423_v9 }
  0x82   : > { %vm424_vm0 = vmor %vm326_vm7, %vm376_vm8 }
  0x83   : > { %vm521_vm15 = vmor %vm423_vm10, %vm473_vm9  ;;  %vm307_vm9 = vcmp.eq.s32.totalorder %v258_v35, %v1419_v5  ;;  %vm357_vm10 = vcmp.eq.s32.totalorder %v258_v35, %v1421_v8 }
  0x84   : > { %vm522_vm6 = vmor %vm424_vm0, %vm474_vm1  ;;  %vm308_vm0 = vcmp.eq.s32.totalorder %v259_v36, %v1419_v5 }
  0x85   : > { %vm993_vm11 = vmpackc.low %vm522_vm6, %vm521_vm15  ;;  %vm358_vm15 = vcmp.eq.s32.totalorder %v259_v36, %v1421_v8 }
  0x86   : > { %994 = vmatpush.bf16.msk.msra.mxu2 %vm993_vm11, %v1260_v14  ;;  %vm389_vm13 = vmor %vm291_vm4, %vm341_vm5  ;;  %vm455_vm11 = vcmp.eq.s32.totalorder %v258_v35, %v1423_v9  ;;  %vm456_vm5 = vcmp.eq.s32.totalorder %v259_v36, %v1423_v9 }
  0x87   : > { %vm390_vm7 = vmor %vm292_vm2, %vm342_vm3 }
  0x88   : > { %vm487_vm8 = vmor %vm389_vm13, %vm439_vm14  ;;  %vm323_vm14 = vcmp.eq.s32.totalorder %v274_v37, %v1419_v5  ;;  %vm373_vm13 = vcmp.eq.s32.totalorder %v274_v37, %v1421_v8 }
  0x89   : > { %vm488_vm1 = vmor %vm390_vm7, %vm440_vm12  ;;  %vm324_vm7 = vcmp.eq.s32.totalorder %v275_v38, %v1419_v5 }
  0x8a   : > { %vm963_vm6 = vmpackc.low %vm488_vm1, %vm487_vm8  ;;  %vm374_vm8 = vcmp.eq.s32.totalorder %v275_v38, %v1421_v8 }
  0x8b   : > { %964 = vmatpush.bf16.msk.msra.mxu0 %vm963_vm6, %v1260_v14  ;;  %vm405_vm4 = vmor %vm307_vm9, %vm357_vm10  ;;  %1019 = vmatpush.bf16.msk.msra.mxu3 %vm963_vm6, %v1260_v14  ;;  %vm471_vm9 = vcmp.eq.s32.totalorder %v274_v37, %v1423_v9 }
  0x8c   : > { %vm406_vm2 = vmor %vm308_vm0, %vm358_vm15  ;;  %vm472_vm0 = vcmp.eq.s32.totalorder %v275_v38, %v1423_v9 }
  0x8d   : > { %vm503_vm3 = vmor %vm405_vm4, %vm455_vm11  ;;  %vm289_vm11 = vcmp.eq.s32.totalorder %v240_v39, %v1419_v5  ;;  %vm339_vm4 = vcmp.eq.s32.totalorder %v240_v39, %v1421_v8 }
  0x8e   : > { %vm504_vm12 = vmor %vm406_vm2, %vm456_vm5  ;;  %vm290_vm2 = vcmp.eq.s32.totalorder %v241_v40, %v1419_v5 }
  0x8f   : > { %vm979_vm1 = vmpackc.low %vm504_vm12, %vm503_vm3  ;;  %vm340_vm3 = vcmp.eq.s32.totalorder %v241_v40, %v1421_v8 }
  0x90   : > { %980 = vmatpush.bf16.msk.msra.mxu1 %vm979_vm1, %v1260_v14  ;;  %vm421_vm10 = vmor %vm323_vm14, %vm373_vm13  ;;  %vm437_vm1 = vcmp.eq.s32.totalorder %v240_v39, %v1423_v9  ;;  %vm438_vm13 = vcmp.eq.s32.totalorder %v241_v40, %v1423_v9 }
  0x91   : > { %vm422_vm15 = vmor %vm324_vm7, %vm374_vm8 }
  0x92   : > { %vm519_vm6 = vmor %vm421_vm10, %vm471_vm9  ;;  %vm305_vm9 = vcmp.eq.s32.totalorder %v256_v41, %v1419_v5  ;;  %vm355_vm10 = vcmp.eq.s32.totalorder %v256_v41, %v1421_v8 }
  0x93   : > { %vm520_vm5 = vmor %vm422_vm15, %vm472_vm0  ;;  %vm306_vm15 = vcmp.eq.s32.totalorder %v257_v42, %v1419_v5 }
  0x94   : > { %vm995_vm12 = vmpackc.low %vm520_vm5, %vm519_vm6  ;;  %vm356_vm6 = vcmp.eq.s32.totalorder %v257_v42, %v1421_v8 }
  0x95   : > { %996 = vmatpush.bf16.msk.msra.mxu2 %vm995_vm12, %v1260_v14  ;;  %vm387_vm14 = vmor %vm289_vm11, %vm339_vm4  ;;  %vm453_vm12 = vcmp.eq.s32.totalorder %v256_v41, %v1423_v9  ;;  %vm454_vm4 = vcmp.eq.s32.totalorder %v257_v42, %v1423_v9 }
  0x96   : > { %vm388_vm7 = vmor %vm290_vm2, %vm340_vm3 }
  0x97   : > { %vm485_vm8 = vmor %vm387_vm14, %vm437_vm1  ;;  %vm321_vm1 = vcmp.eq.s32.totalorder %v272_v43, %v1419_v5  ;;  %vm371_vm14 = vcmp.eq.s32.totalorder %v272_v43, %v1421_v8 }
  0x98   : > { %vm486_vm0 = vmor %vm388_vm7, %vm438_vm13  ;;  %vm322_vm7 = vcmp.eq.s32.totalorder %v273_v44, %v1419_v5 }
  0x99   : > { %vm965_vm5 = vmpackc.low %vm486_vm0, %vm485_vm8  ;;  %vm372_vm8 = vcmp.eq.s32.totalorder %v273_v44, %v1421_v8 }
  0x9a   : > { %966 = vmatpush.bf16.msk.msra.mxu0 %vm965_vm5, %v1260_v14  ;;  %vm403_vm11 = vmor %vm305_vm9, %vm355_vm10  ;;  %1020 = vmatpush.bf16.msk.msra.mxu3 %vm965_vm5, %v1260_v14  ;;  %vm469_vm9 = vcmp.eq.s32.totalorder %v272_v43, %v1423_v9 }
  0x9b   : > { %vm404_vm2 = vmor %vm306_vm15, %vm356_vm6  ;;  %vm470_vm15 = vcmp.eq.s32.totalorder %v273_v44, %v1423_v9 }
  0x9c   : > { %vm501_vm3 = vmor %vm403_vm11, %vm453_vm12  ;;  %vm287_vm12 = vcmp.eq.s32.totalorder %v1588_v45, %v1419_v5  ;;  %vm337_vm11 = vcmp.eq.s32.totalorder %v1588_v45, %v1421_v8 }
  0x9d   : > { %vm502_vm13 = vmor %vm404_vm2, %vm454_vm4  ;;  %vm288_vm2 = vcmp.eq.s32.totalorder %v1592_v46, %v1419_v5 }
  0x9e   : > { %vm981_vm0 = vmpackc.low %vm502_vm13, %vm501_vm3  ;;  %vm338_vm3 = vcmp.eq.s32.totalorder %v1592_v46, %v1421_v8 }
  0x9f   : > { %982 = vmatpush.bf16.msk.msra.mxu1 %vm981_vm0, %v1260_v14  ;;  %vm419_vm10 = vmor %vm321_vm1, %vm371_vm14  ;;  %vm435_vm14 = vcmp.eq.s32.totalorder %v1588_v45, %v1423_v9 }
  0xa0   : > { %vm420_vm6 = vmor %vm322_vm7, %vm372_vm8  ;;  %vm436_vm7 = vcmp.eq.s32.totalorder %v1592_v46, %v1423_v9 }
  0xa1   : > { %vm517_vm5 = vmor %vm419_vm10, %vm469_vm9  ;;  %vm303_vm9 = vcmp.eq.s32.totalorder %v254_v47, %v1419_v5  ;;  %vm353_vm10 = vcmp.eq.s32.totalorder %v254_v47, %v1421_v8 }
  0xa2   : > { %vm518_vm4 = vmor %vm420_vm6, %vm470_vm15  ;;  %vm304_vm6 = vcmp.eq.s32.totalorder %v255_v48, %v1419_v5 }
  0xa3   : > { %vm997_vm1 = vmpackc.low %vm518_vm4, %vm517_vm5  ;;  %vm354_vm5 = vcmp.eq.s32.totalorder %v255_v48, %v1421_v8 }
  0xa4   : > { %998 = vmatpush.bf16.msk.msra.mxu2 %vm997_vm1, %v1260_v14  ;;  %vm385_vm13 = vmor %vm287_vm12, %vm337_vm11  ;;  %vm451_vm1 = vcmp.eq.s32.totalorder %v254_v47, %v1423_v9  ;;  %vm452_vm11 = vcmp.eq.s32.totalorder %v255_v48, %v1423_v9 }
  0xa5   : > { %vm386_vm8 = vmor %vm288_vm2, %vm338_vm3 }
  0xa6   : > { %vm483_vm0 = vmor %vm385_vm13, %vm435_vm14  ;;  %vm319_vm14 = vcmp.eq.s32.totalorder %v270_v49, %v1419_v5  ;;  %vm369_vm13 = vcmp.eq.s32.totalorder %v270_v49, %v1421_v8 }
  0xa7   : > { %vm484_vm15 = vmor %vm386_vm8, %vm436_vm7  ;;  %vm320_vm8 = vcmp.eq.s32.totalorder %v271_v50, %v1419_v5 }
  0xa8   : > { %vm967_vm4 = vmpackc.low %vm484_vm15, %vm483_vm0  ;;  %vm370_vm0 = vcmp.eq.s32.totalorder %v271_v50, %v1421_v8 }
  0xa9   : > { %968 = vmatpush.bf16.msk.msra.mxu0 %vm967_vm4, %v1260_v14  ;;  %vm401_vm12 = vmor %vm303_vm9, %vm353_vm10  ;;  %1021 = vmatpush.bf16.msk.msra.mxu3 %vm967_vm4, %v1260_v14  ;;  %vm467_vm9 = vcmp.eq.s32.totalorder %v270_v49, %v1423_v9 }
  0xaa   : > { %vm402_vm2 = vmor %vm304_vm6, %vm354_vm5  ;;  %vm468_vm6 = vcmp.eq.s32.totalorder %v271_v50, %v1423_v9 }
  0xab   : > { %vm499_vm3 = vmor %vm401_vm12, %vm451_vm1  ;;  %vm285_vm1 = vcmp.eq.s32.totalorder %v1415_v1, %v1419_v5  ;;  %vm335_vm12 = vcmp.eq.s32.totalorder %v1415_v1, %v1421_v8 }
  0xac   : > { %vm500_vm7 = vmor %vm402_vm2, %vm452_vm11  ;;  %vm286_vm2 = vcmp.eq.s32.totalorder %v1627_v51, %v1419_v5 }
  0xad   : > { %vm983_vm15 = vmpackc.low %vm500_vm7, %vm499_vm3  ;;  %vm336_vm3 = vcmp.eq.s32.totalorder %v1627_v51, %v1421_v8 }
  0xae   : > { %984 = vmatpush.bf16.msk.msra.mxu1 %vm983_vm15, %v1260_v14  ;;  %vm417_vm10 = vmor %vm319_vm14, %vm369_vm13  ;;  %vm433_vm13 = vcmp.eq.s32.totalorder %v1415_v1, %v1423_v9 }
  0xaf   : > { %vm418_vm5 = vmor %vm320_vm8, %vm370_vm0  ;;  %vm434_vm8 = vcmp.eq.s32.totalorder %v1627_v51, %v1423_v9 }
  0xb0   : > { %vm515_vm4 = vmor %vm417_vm10, %vm467_vm9  ;;  %vm301_vm9 = vcmp.eq.s32.totalorder %v252_v52, %v1419_v5  ;;  %vm351_vm10 = vcmp.eq.s32.totalorder %v252_v52, %v1421_v8 }
  0xb1   : > { %vm516_vm11 = vmor %vm418_vm5, %vm468_vm6  ;;  %vm302_vm5 = vcmp.eq.s32.totalorder %v253_v53, %v1419_v5 }
  0xb2   : > { %vm999_vm14 = vmpackc.low %vm516_vm11, %vm515_vm4  ;;  %vm352_vm4 = vcmp.eq.s32.totalorder %v253_v53, %v1421_v8 }
  0xb3   : > { %1000 = vmatpush.bf16.msk.msra.mxu2 %vm999_vm14, %v1260_v14  ;;  %vm383_vm7 = vmor %vm285_vm1, %vm335_vm12  ;;  %vm449_vm12 = vcmp.eq.s32.totalorder %v252_v52, %v1423_v9 }
  0xb4   : > { %vm384_vm0 = vmor %vm286_vm2, %vm336_vm3  ;;  %vm450_vm2 = vcmp.eq.s32.totalorder %v253_v53, %v1423_v9 }
  0xb5   : > { %vm1646_vm15 = vmor %vm383_vm7, %vm433_vm13  ;;  %vm317_vm13 = vcmp.eq.s32.totalorder %v268_v59, %v1419_v5  ;;  %vm367_vm7 = vcmp.eq.s32.totalorder %v268_v59, %v1421_v8 }
  0xb6   : > { %vm482_vm6 = vmor %vm384_vm0, %vm434_vm8  ;;  %vm318_vm0 = vcmp.eq.s32.totalorder %v269_v60, %v1419_v5  ;;  %v942_v5 = vor.u32 %v1011_v4, %v941_v3 }
  0xb7   : > { %vm969_vm1 = vmpackc.low %vm482_vm6, %vm1646_vm15  ;;  %vm368_vm15 = vcmp.eq.s32.totalorder %v269_v60, %v1421_v8  ;;  %v950_v8 = vor.u32 %v1012_v6, %v947_v7 }
  0xb8   : > { %970 = vmatpush.bf16.msk.msra.mxu0 %vm969_vm1, %v1260_v14  ;;  %vm399_vm11 = vmor %vm301_vm9, %vm351_vm10  ;;  %1022 = vmatpush.bf16.msk.msra.mxu3 %vm969_vm1, %v1260_v14  ;;  %vm465_vm10 = vcmp.eq.s32.totalorder %v268_v59, %v1423_v9 }
  0xb9   : > { %vm400_vm3 = vmor %vm302_vm5, %vm352_vm4  ;;  %vm466_vm5 = vcmp.eq.s32.totalorder %v269_v60, %v1423_v9 }
  0xba   : > { %vm497_vm14 = vmor %vm399_vm11, %vm449_vm12 }
  0xbb   : > { %vm498_vm8 = vmor %vm400_vm3, %vm450_vm2  ;;  %697 = vmatmul.bf16.vlgmr.msra.gmra.mxu0 %v934_v61  ;;  %702 = vmatmul.bf16.vlgmr.msra.gmra.mxu3 %v946_v62 }
  0xbc   : > { %vm985_vm9 = vmpackc.low %vm498_vm8, %vm497_vm14 }
  0xbd   : > { %986 = vmatpush.bf16.msk.msra.mxu1 %vm985_vm9, %v1260_v14  ;;  %vm415_vm6 = vmor %vm317_vm13, %vm367_vm7 }
  0xbe   : > { %vm416_vm4 = vmor %vm318_vm0, %vm368_vm15 }
  0xbf   : > { %vm513_vm1 = vmor %vm415_vm6, %vm465_vm10 }
  0xc0   : > { %vm514_vm12 = vmor %vm416_vm4, %vm466_vm5  ;;  %716 = vmatmul.bf16.vlgmr.msra.gmra.mxu1 %v938_v2 }
  0xc1   : > { %vm1001_vm11 = vmpackc.low %vm514_vm12, %vm513_vm1 }
  0xc2   : > { %1002 = vmatpush.bf16.msk.msra.mxu2 %vm1001_vm11, %v1260_v14  ;;  %v1090_v14 = vld [vmem:[%s194_s21] ss:$0 sm:$0xff] }
  0xc3   : > { %vm749_vm2 = vcmp.eq.s32.totalorder %v1627_v51, %v1090_v14  ;;  %vm748_vm3 = vcmp.eq.s32.totalorder %v1415_v1, %v1090_v14  ;;  %vm750_vm14 = vcmp.eq.s32.totalorder %v1588_v45, %v1090_v14  ;;  %vm751_vm13 = vcmp.eq.s32.totalorder %v1592_v46, %v1090_v14 }
  0xc4   : > { %v1004_v27 = vsel %vm749_vm2, 1.0, %v1261_v26  ;;  %v1003_v30 = vsel %vm748_vm3, 1.0, %v1261_v26  ;;  %v1005_v31 = vsel %vm750_vm14, 1.0, %v1261_v26  ;;  %v1006_v38 = vsel %vm751_vm13, 1.0, %v1261_v26 }
  0xc5   : > { %735 = vmatmul.bf16.vlgmr.msra.gmra.mxu2 %v942_v5 }
  0xd0   : > { %721 = vmatmul.bf16.gmra.mxu1 %v950_v8 }
  0xd5   : > { %740 = vmatmul.bf16.gmra.mxu2 %v954_v12 }
 0x138   : > { %v698_v16 = vpop.f32.mrf.mxu0 }
 0x13d   : > { %v717_v9 = vpop.f32.mrf.mxu1 }
 0x13e   : > { %v703_v20 = vpop.f32.mrf.mxu3  ;;  %v718_v21 = vadd.f32 %v717_v9, %v698_v16 }
 0x140   : > { %v700_v19 = vpop.f32.mrf.mxu0 }
 0x145   : > { %v719_v15 = vpop.f32.mrf.mxu1 }
 0x146   : > { %v720_v22 = vadd.f32 %v719_v15, %v700_v19  ;;  %v705_v34 = vpop.f32.mrf.mxu3 }
 0x148   : > { %v736_v13 = vpop.f32.mrf.mxu2 }
 0x149   : > { %v737_v28 = vadd.f32 %v736_v13, %v718_v21 }
 0x14b   : > { %v760_v35 = vmul.f32 %v1003_v30, %v737_v28 }
 0x14d   : > { %v722_v18 = vpop.f32.mrf.mxu1 }
 0x14e   : > { %v723_v23 = vadd.f32 %v722_v18, %v703_v20 }
 0x150   : > { %v738_v17 = vpop.f32.mrf.mxu2 }
 0x151   : > { %v739_v25 = vadd.f32 %v738_v17, %v720_v22 }
 0x153   : > { %v761_v33 = vmul.f32 %v1004_v27, %v739_v25 }
 0x155   : > { %v724_v32 = vpop.f32.mrf.mxu1  ;;  %v764_v39 = vadd.f32 %v761_v33, %v760_v35 }
 0x156   : > { %v725_v37 = vadd.f32 %v724_v32, %v705_v34 }
 0x158   : > { %v741_v24 = vpop.f32.mrf.mxu2 }
 0x159   : > { %v742_v29 = vadd.f32 %v741_v24, %v723_v23 }
 0x15b   : > { %v762_v36 = vmul.f32 %v1005_v31, %v742_v29 }
 0x15d   : > { %v765_v41 = vadd.f32 %v764_v39, %v762_v36 }
 0x160   : > { %v743_v1 = vpop.f32.mrf.mxu2 }
 0x161   : > { %v744_v40 = vadd.f32 %v743_v1, %v725_v37 }
 0x163   : > { %v763_v42 = vmul.f32 %v1006_v38, %v744_v40 }
 0x165   : > { %v766_v43 = vadd.f32 %v765_v41, %v763_v42 }
 0x167   : > { %v767_v44 = vrot.slane %v766_v43, 4 }
 0x169   : > { %v768_v45 = vadd.f32 %v767_v44, %v766_v43 }
 0x16b   : > { %v769_v47 = vrot.slane %v768_v45, 2 }
 0x16d   : > { %v770_v46 = vadd.f32 %v769_v47, %v768_v45 }
 0x16f   : > { %v771_v48 = vrot.slane %v770_v46, 1 }
 0x171   : > { %v772_v49 = vadd.f32 %v771_v48, %v770_v46 }
 0x173   : > { %773 = vst [vmem:[%s233_s25] sm:$0x1] %v772_v49 }
 0x174   : > { %1208 = shalt.err (!%p1205_p8)
}
 0x175   : > { %1031 = dma.vmem_to_hbm [thread:$0]  (%p1345_p13), %s786_s16, 16, %s788_s22, %s775_s23  }
 0x176 PF: > { %p1051_p10 = scmp.ge.s32.totalorder %s1255_s15, 2  ;;  %s799_s11 = sand.u32 1, %s1243_s12  }
 0x177   : > { %s800_s6 = scalar_lea.sflag [#allocation4], %s799_s11 }
 0x178   : > { %p1045_p9 = pnand %p1051_p10, %p1351_p4 }
 0x17a   : > { %p1046_p11 = pneg %p1045_p9 }
 0x17c   : > { %1238 = dma.done.wait (%p1046_p11), %s800_s6, 16  }
 0x17d   : > { %1240 = vsyncadd (%p1046_p11), %s800_s6, 4294967280  ;;  %s1724_s17 = sld [smem:[#allocation13_spill]]  ;;  %p19_p0 = scmp.ge.s32.totalorder %s1321_s26, 5  }
 0x17e   : > { %s1725_s12 = smov %s1247_s13  ;;  %s1726_s13 = smov %s1251_s14 }
 0x17f   : > { %s1728_s15 = smov %s1321_s26  ;;  %21 = sbr.rel (!%p19_p0) target bundleno = 9 (0x9), region = 94 }
 0x183   : > { %s1727_s14 = smov %s1724_s17 }
 0x184   :  { %805 = vsyncpa [#allocation3], 1 }
 0x185   :  { %807 = vsyncpa [#allocation3 + $0x1], 1 }
 0x186   :  { %808 = vsyncpa [#allocation6], 1 }
 0x187   :  { %810 = vsyncpa [#allocation6 + $0x1], 1 }
 0x188   :  { %811 = vsyncpa [#allocation4], 1 }
 0x189   :  { %813 = vsyncpa [#allocation4 + $0x1], 1 }

</bundles_post_ra>
